<compile_context>
chip_gen: v7x
topology: tpu7x:2x2x1
jax: 0.10.0
libtpu: 0.0.40
codegen_flags: <defaults>
</compile_context>

<pallas_src>
import functools

import jax
import jax.numpy as jnp
from jax.experimental import pallas as pl
from jax.experimental.pallas import tpu as pltpu

_MiB = 1024 * 1024


def _encoder_layer_kernel(
    x_ref,        # (Bb, S, D)            f32
    wqkv_ref,     # (D, H*(2*dk+dv))      matmul dtype; q cols pre-scaled by 1/sqrt(dk)
    wo_ref,       # (H, dv, D)            matmul dtype (head-major output projection)
    ln1_g_ref,    # (1, D)  f32
    ln1_b_ref,    # (1, D)  f32
    w1_ref,       # (D, F)                matmul dtype
    b1_ref,       # (1, F)  f32
    w2_ref,       # (F, D)                matmul dtype
    b2_ref,       # (1, D)  f32
    ln2_g_ref,    # (1, D)  f32
    ln2_b_ref,    # (1, D)  f32
    out_ref,      # (Bb, S, D)
    *rest,        # (attn_ref,) when return_attn: (Bb, H, S, S)
    n_heads: int,
    d_k: int,
    d_v: int,
    return_attn: bool,
    matmul_dtype,
):
    attn_ref = rest[0] if return_attn else None

    Bb, S, D = x_ref.shape
    h_dk = n_heads * d_k
    qkv_cols = n_heads * (2 * d_k + d_v)
    eps = jnp.float32(1e-6)

    x = x_ref[...]                                   # (Bb, S, D) f32
    x2d = x.reshape(Bb * S, D)                       # leading-dim merge (cheap)

    # --- fused QKV projection (bias-free); 1/sqrt(d_k) already folded into wq cols ---
    qkv = jnp.dot(x2d.astype(matmul_dtype), wqkv_ref[...],
                  preferred_element_type=jnp.float32)             # (Bb*S, cols) f32
    # Single cast for all per-head slices (removes ~3H per-step cast passes).
    qkv_mm = qkv.reshape(Bb, S, qkv_cols).astype(matmul_dtype)

    # --- per-head attention; heads accumulated directly into the output projection ---
    # (no ctx scratch, no lane-masked sub-128 stores; per-head wo slice is a leading-
    #  axis load from the head-major (H, dv, D) weight)
    attn_out = jnp.zeros((Bb * S, D), jnp.float32)
    for h in range(n_heads):
        qh = qkv_mm[:, :, h * d_k:(h + 1) * d_k]                          # (Bb,S,dk)
        kh = qkv_mm[:, :, h_dk + h * d_k:h_dk + (h + 1) * d_k]            # (Bb,S,dk)
        vh = qkv_mm[:, :, 2 * h_dk + h * d_v:2 * h_dk + (h + 1) * d_v]    # (Bb,S,dv)

        s = jnp.einsum("bqd,bkd->bqk", qh, kh,
                       preferred_element_type=jnp.float32)        # (Bb, S, S) f32
        s = s - jnp.max(s, axis=-1, keepdims=True)
        p = jnp.exp(s)                                            # un-normalised, f32
        denom = jnp.sum(p, axis=-1, keepdims=True)                # (Bb, S, 1)

        if return_attn:
            # Exact normalisation only for the returned attention map (rows sum to 1).
            attn_ref[:, h, :, :] = (p * (1.0 / denom)).astype(attn_ref.dtype)

        ctx_h = jnp.einsum("bqk,bkd->bqd", p.astype(matmul_dtype), vh,
                           preferred_element_type=jnp.float32)    # (Bb, S, dv)
        # Deferred softmax normalisation on the small (Bb,S,dv) tensor (EUP reciprocal).
        ctx_h = ctx_h * pl.reciprocal(denom, approx=True)

        attn_out = attn_out + jnp.dot(
            ctx_h.reshape(Bb * S, d_v).astype(matmul_dtype), wo_ref[h],
            preferred_element_type=jnp.float32)                   # (Bb*S, D)

    # --- residual + LayerNorm 1 (f32) ---
    res1 = attn_out + x2d
    mu1 = jnp.mean(res1, axis=-1, keepdims=True)
    var1 = jnp.mean((res1 - mu1) ** 2, axis=-1, keepdims=True)
    y1 = (res1 - mu1) * jax.lax.rsqrt(var1 + eps)
    y1 = y1 * ln1_g_ref[...] + ln1_b_ref[...]

    # --- position-wise FFN + residual + LayerNorm 2 ---
    hdn = jnp.dot(y1.astype(matmul_dtype), w1_ref[...],
                  preferred_element_type=jnp.float32) + b1_ref[...]
    hdn = jnp.maximum(hdn, 0.0)
    ff = jnp.dot(hdn.astype(matmul_dtype), w2_ref[...],
                 preferred_element_type=jnp.float32) + b2_ref[...]
    res2 = ff + y1
    mu2 = jnp.mean(res2, axis=-1, keepdims=True)
    var2 = jnp.mean((res2 - mu2) ** 2, axis=-1, keepdims=True)
    y2 = (res2 - mu2) * jax.lax.rsqrt(var2 + eps)
    y2 = y2 * ln2_g_ref[...] + ln2_b_ref[...]

    out_ref[...] = y2.reshape(Bb, S, D).astype(out_ref.dtype)


def _vmem_capacity_bytes() -> int:
    """Physical VMEM per TensorCore; conservative 64 MiB (v7x) if the query fails."""
    try:
        info = pltpu.get_tpu_info()
        cap = getattr(info, "vmem_capacity_bytes", None)
        if cap:
            return int(cap)
    except Exception:
        pass
    return 64 * _MiB


def _footprint_bytes(block_b, S, D, d_ffn, n_heads, d_k, d_v,
                     return_attn, attn_itemsize, mm_itemsize,
                     weights_single_buffered):
    """Rough per-grid-step VMEM footprint estimate (bytes)."""
    f32 = 4
    rows = block_b * S
    qkv_cols = n_heads * (2 * d_k + d_v)
    # Pipelined (double-buffered) I/O blocks.
    total = 2 * rows * D * f32                       # x in
    total += 2 * rows * D * f32                      # out
    if return_attn:
        total += 2 * block_b * n_heads * S * S * attn_itemsize
    # Weights + biases / LayerNorm params.
    wbytes = (D * qkv_cols + n_heads * d_v * D + D * d_ffn + d_ffn * D) * mm_itemsize
    wbytes += (5 * D + d_ffn) * f32
    total += wbytes * (1 if weights_single_buffered else 2)
    # Live intermediates (upper-bound-ish).
    total += rows * qkv_cols * (f32 + mm_itemsize)   # qkv f32 + matmul-dtype copy
    total += 3 * block_b * S * S * f32               # scores / p / temporaries (one head)
    total += 6 * rows * D * f32                      # attn_out, res1, y1, ff, res2, y2
    total += rows * d_ffn * (f32 + mm_itemsize)      # FFN hidden (+ cast)
    return total


def _select_block_b(B, S, footprint_fn, vmem_capacity):
    """Largest batch-block that (a) divides B, (b) fits the VMEM budget,
    (c) keeps >= 2 grid steps so v7x's two TensorCores both get work."""
    budget = int(vmem_capacity * 0.6)
    rows_cap = 2048 if vmem_capacity >= 96 * _MiB else 1024
    cap_b = B if B < 2 else max(1, B // 2)
    best = 1
    for cand in range(1, B + 1):
        if B % cand:
            continue
        if cand > cap_b or cand * S > rows_cap:
            continue
        if footprint_fn(cand) <= budget:
            best = max(best, cand)
    return best


def transformer_encoder_layer(x, params, *, n_heads, d_k, d_v,
                              block_b=None, return_attn=True,
                              matmul_dtype=jnp.bfloat16,
                              attn_dtype=jnp.float32,
                              single_buffer_weights=None):
    """x: (B, S, D) float32.

    Returns (enc_output (B, S, D), attn_weights (B, H, S, S) or None).
    matmul_dtype=bf16 runs MXU-native matmuls with f32 accumulation; pass jnp.float32
    for bit-closer numerics.  attn_dtype=jnp.bfloat16 halves attention-map writeback.
    """
    B, S, D = x.shape
    d_ffn = params["w1"].shape[1]
    h_dk = n_heads * d_k
    h_dv = n_heads * d_v
    assert params["wq"].shape == (D, h_dk)
    assert params["wk"].shape == (D, h_dk)
    assert params["wv"].shape == (D, h_dv)
    assert params["wo"].shape == (h_dv, D)

    mm_itemsize = jnp.dtype(matmul_dtype).itemsize
    attn_itemsize = jnp.dtype(attn_dtype).itemsize if return_attn else 0
    vmem_cap = _vmem_capacity_bytes()

    def fp(bb, single_buf):
        return _footprint_bytes(bb, S, D, d_ffn, n_heads, d_k, d_v,
                                return_attn, attn_itemsize, mm_itemsize, single_buf)

    if block_b is None:
        # Size conservatively assuming double-buffered weights (fallback path).
        block_b = _select_block_b(B, S, lambda bb: fp(bb, False), vmem_cap)
    assert B % block_b == 0, "block_b must divide batch"
    n_blocks = B // block_b

    footprint = fp(block_b, False)
    vmem_limit = int(min(vmem_cap - 8 * _MiB,
                         max(2 * footprint, 32 * _MiB, footprint + 8 * _MiB)))

    # --- host-side weight prep (done once, outside the kernel) ---
    inv_temp = 1.0 / (float(d_k) ** 0.5)
    wqkv = jnp.concatenate(
        [params["wq"].astype(jnp.float32) * inv_temp, params["wk"], params["wv"]],
        axis=1).astype(matmul_dtype)                           # (D, 2*Hdk + Hdv)
    wo3 = params["wo"].reshape(n_heads, d_v, D).astype(matmul_dtype)
    w1 = params["w1"].astype(matmul_dtype)
    w2 = params["w2"].astype(matmul_dtype)
    f32 = jnp.float32
    ln1_g = params["ln1_g"].astype(f32)
    ln1_b = params["ln1_b"].astype(f32)
    b1 = params["b1"].astype(f32)
    b2 = params["b2"].astype(f32)
    ln2_g = params["ln2_g"].astype(f32)
    ln2_b = params["ln2_b"].astype(f32)

    kernel = functools.partial(
        _encoder_layer_kernel,
        n_heads=n_heads, d_k=d_k, d_v=d_v,
        return_attn=return_attn, matmul_dtype=matmul_dtype)

    def build_and_run(use_single_buffer):
        def const_spec(shape):
            ndim = len(shape)
            imap = lambda b, _n=ndim: (0,) * _n
            if use_single_buffer and hasattr(pl, "Buffered"):
                try:
                    # Constant-index weights: no point double-buffering them.
                    return pl.BlockSpec(shape, imap, pipeline_mode=pl.Buffered(1))
                except TypeError:
                    pass
            return pl.BlockSpec(shape, imap)

        in_specs = [
            pl.BlockSpec((block_b, S, D), lambda b: (b, 0, 0)),   # x
            const_spec((D, 2 * h_dk + h_dv)),                     # wqkv (fused, prescaled)
            const_spec((n_heads, d_v, D)),                        # wo (head-major)
            const_spec((1, D)), const_spec((1, D)),               # ln1 gamma / beta
            const_spec((D, d_ffn)), const_spec((1, d_ffn)),       # w1 / b1
            const_spec((d_ffn, D)), const_spec((1, D)),           # w2 / b2
            const_spec((1, D)), const_spec((1, D)),               # ln2 gamma / beta
        ]

        out_spec_x = pl.BlockSpec((block_b, S, D), lambda b: (b, 0, 0))
        if return_attn:
            out_specs = [
                out_spec_x,
                # Final (B, H, S, S) layout emitted directly: no host-side transpose.
                pl.BlockSpec((block_b, n_heads, S, S), lambda b: (b, 0, 0, 0)),
            ]
            out_shape = (
                jax.ShapeDtypeStruct((B, S, D), x.dtype),
                jax.ShapeDtypeStruct((B, n_heads, S, S), attn_dtype),
            )
        else:
            out_specs = out_spec_x
            out_shape = jax.ShapeDtypeStruct((B, S, D), x.dtype)

        grid_spec = pltpu.PrefetchScalarGridSpec(
            num_scalar_prefetch=0,
            grid=(n_blocks,),
            in_specs=in_specs,
            out_specs=out_specs,
        )

        return pl.pallas_call(
            kernel,
            out_shape=out_shape,
            grid_spec=grid_spec,
            compiler_params=pltpu.CompilerParams(
                dimension_semantics=("parallel",),
                vmem_limit_bytes=int(vmem_limit)),
        )(x, wqkv, wo3, ln1_g, ln1_b, w1, b1, w2, b2, ln2_g, ln2_b)

    if single_buffer_weights is None:
        try:
            result = build_and_run(True)
        except Exception:
            # Older JAX / unsupported pipeline_mode: fall back to default buffering.
            result = build_and_run(False)
    else:
        result = build_and_run(bool(single_buffer_weights))

    if return_attn:
        out, attn = result
        return out, attn
    return result, None


def _reference(x, params, *, n_heads, d_k, d_v):
    """Pure-JAX reference mirroring the PyTorch forward (eval mode)."""
    B, S, D = x.shape
    temperature = jnp.sqrt(jnp.float32(d_k))
    q = (x @ params["wq"]).reshape(B, S, n_heads, d_k).transpose(0, 2, 1, 3)
    k = (x @ params["wk"]).reshape(B, S, n_heads, d_k).transpose(0, 2, 1, 3)
    v = (x @ params["wv"]).reshape(B, S, n_heads, d_v).transpose(0, 2, 1, 3)
    scores = jnp.einsum("bhqd,bhkd->bhqk", q / temperature, k)
    attn = jax.nn.softmax(scores, axis=-1)
    ctx = jnp.einsum("bhqk,bhkd->bhqd", attn, v)
    ctx = ctx.transpose(0, 2, 1, 3).reshape(B, S, n_heads * d_v)
    attn_out = ctx @ params["wo"]

    def ln(z, g, b):
        mu = z.mean(-1, keepdims=True)
        var = ((z - mu) ** 2).mean(-1, keepdims=True)
        return (z - mu) / jnp.sqrt(var + 1e-6) * g + b

    y1 = ln(attn_out + x, params["ln1_g"], params["ln1_b"])
    h = jax.nn.relu(y1 @ params["w1"] + params["b1"])
    ff = h @ params["w2"] + params["b2"]
    y2 = ln(ff + y1, params["ln2_g"], params["ln2_b"])
    return y2, attn


if __name__ == "__main__":
    # Small shapes consistent with the module.
    B, S = 2, 8
    d_model, n_heads, d_k, d_v, d_ffn = 32, 2, 16, 16, 64

    key = jax.random.PRNGKey(0)
    keys = jax.random.split(key, 8)
    scale = 0.1
    params = {
        "wq": scale * jax.random.normal(keys[0], (d_model, n_heads * d_k), jnp.float32),
        "wk": scale * jax.random.normal(keys[1], (d_model, n_heads * d_k), jnp.float32),
        "wv": scale * jax.random.normal(keys[2], (d_model, n_heads * d_v), jnp.float32),
        "wo": scale * jax.random.normal(keys[3], (n_heads * d_v, d_model), jnp.float32),
        "ln1_g": jnp.ones((1, d_model), jnp.float32),
        "ln1_b": jnp.zeros((1, d_model), jnp.float32),
        "w1": scale * jax.random.normal(keys[4], (d_model, d_ffn), jnp.float32),
        "b1": 0.01 * jnp.ones((1, d_ffn), jnp.float32),
        "w2": scale * jax.random.normal(keys[5], (d_ffn, d_model), jnp.float32),
        "b2": 0.01 * jnp.ones((1, d_model), jnp.float32),
        "ln2_g": jnp.ones((1, d_model), jnp.float32),
        "ln2_b": jnp.zeros((1, d_model), jnp.float32),
    }
    x = jax.random.normal(keys[6], (B, S, d_model), jnp.float32)

    ref_out, ref_attn = _reference(x, params, n_heads=n_heads, d_k=d_k, d_v=d_v)

    # 1) f32 matmul path: tight structural/numerical check against the reference.
    out32, attn32 = transformer_encoder_layer(
        x, params, n_heads=n_heads, d_k=d_k, d_v=d_v,
        return_attn=True, matmul_dtype=jnp.float32)
    out32 = jax.block_until_ready(out32)
    attn32 = jax.block_until_ready(attn32)
    assert jnp.allclose(out32, ref_out, atol=5e-3, rtol=5e-3), "f32 enc_output mismatch"
    assert jnp.allclose(attn32, ref_attn, atol=1e-3, rtol=1e-3), "f32 attn_weights mismatch"

    # 2) Default bf16 matmul path (MXU-native): looser tolerance.
    out, attn = transformer_encoder_layer(
        x, params, n_heads=n_heads, d_k=d_k, d_v=d_v, return_attn=True)
    out = jax.block_until_ready(out)
    attn = jax.block_until_ready(attn)
    assert jnp.allclose(out, ref_out, atol=4e-2, rtol=4e-2), "bf16 enc_output mismatch"
    assert jnp.allclose(attn, ref_attn, atol=2e-2, rtol=2e-2), "bf16 attn_weights mismatch"

    # 3) Bandwidth-lean path: skip the attention-weights HBM write entirely.
    out_na, attn_na = transformer_encoder_layer(
        x, params, n_heads=n_heads, d_k=d_k, d_v=d_v, return_attn=False)
    out_na = jax.block_until_ready(out_na)
    assert attn_na is None
    assert jnp.allclose(out_na, out, atol=1e-3, rtol=1e-3), "no-attn path mismatch"

    print("KERNEL_OK")
</pallas_src>

<mosaic_0001>
module attributes {stable_mosaic.version = 11 : i64} {
  func.func @_encoder_layer_kernel(%arg0: i32, %arg1: memref<1x8x32xf32, #tpu.memory_space<vmem>>, %arg2: memref<32x96xf32, #tpu.memory_space<vmem>>, %arg3: memref<2x16x32xf32, #tpu.memory_space<vmem>>, %arg4: memref<1x32xf32, #tpu.memory_space<vmem>>, %arg5: memref<1x32xf32, #tpu.memory_space<vmem>>, %arg6: memref<32x64xf32, #tpu.memory_space<vmem>>, %arg7: memref<1x64xf32, #tpu.memory_space<vmem>>, %arg8: memref<64x32xf32, #tpu.memory_space<vmem>>, %arg9: memref<1x32xf32, #tpu.memory_space<vmem>>, %arg10: memref<1x32xf32, #tpu.memory_space<vmem>>, %arg11: memref<1x32xf32, #tpu.memory_space<vmem>>, %arg12: memref<1x8x32xf32, #tpu.memory_space<vmem>>, %arg13: memref<1x2x8x8xf32, #tpu.memory_space<vmem>>) attributes {dimension_semantics = [#tpu.dimension_semantics<parallel>], iteration_bounds = array<i64: 2>, scalar_prefetch = 0 : i64, scratch_operands = 0 : i64, tpu.core_type = #tpu.core_type<tc>, window_params = [{transform_indices = @transform_0, window_bounds = array<i64: 1, 8, 32>}, {pipeline_mode = #tpu.pipeline_mode<synchronous>, transform_indices = @transform_1, window_bounds = array<i64: 32, 96>}, {pipeline_mode = #tpu.pipeline_mode<synchronous>, transform_indices = @transform_2, window_bounds = array<i64: 2, 16, 32>}, {pipeline_mode = #tpu.pipeline_mode<synchronous>, transform_indices = @transform_3, window_bounds = array<i64: 1, 32>}, {pipeline_mode = #tpu.pipeline_mode<synchronous>, transform_indices = @transform_4, window_bounds = array<i64: 1, 32>}, {pipeline_mode = #tpu.pipeline_mode<synchronous>, transform_indices = @transform_5, window_bounds = array<i64: 32, 64>}, {pipeline_mode = #tpu.pipeline_mode<synchronous>, transform_indices = @transform_6, window_bounds = array<i64: 1, 64>}, {pipeline_mode = #tpu.pipeline_mode<synchronous>, transform_indices = @transform_7, window_bounds = array<i64: 64, 32>}, {pipeline_mode = #tpu.pipeline_mode<synchronous>, transform_indices = @transform_8, window_bounds = array<i64: 1, 32>}, {pipeline_mode = #tpu.pipeline_mode<synchronous>, transform_indices = @transform_9, window_bounds = array<i64: 1, 32>}, {pipeline_mode = #tpu.pipeline_mode<synchronous>, transform_indices = @transform_10, window_bounds = array<i64: 1, 32>}, {transform_indices = @transform_11, window_bounds = array<i64: 1, 8, 32>}, {transform_indices = @transform_12, window_bounds = array<i64: 1, 2, 8, 8>}]} {
    %c0 = arith.constant 0 : index
    %c0_0 = arith.constant 0 : index
    %c0_1 = arith.constant 0 : index
    %0 = vector.load %arg1[%c0, %c0_0, %c0_1] : memref<1x8x32xf32, #tpu.memory_space<vmem>>, vector<1x8x32xf32>
    %1 = vector.shape_cast %0 : vector<1x8x32xf32> to vector<8x32xf32>
    %c0_2 = arith.constant 0 : index
    %c0_3 = arith.constant 0 : index
    %2 = vector.load %arg2[%c0_2, %c0_3] : memref<32x96xf32, #tpu.memory_space<vmem>>, vector<32x96xf32>
    %cst = arith.constant dense<0.000000e+00> : vector<8x96xf32>
    %3 = tpu.matmul %1, %2, %cst {dimension_numbers = #tpu.dot_dimension_numbers<[1], [0], [0], [1], [0, 0, 1, 1], [], []>} : vector<8x32xf32>, vector<32x96xf32>, vector<8x96xf32> -> vector<8x96xf32>
    %4 = vector.shape_cast %3 : vector<8x96xf32> to vector<1x8x96xf32>
    %cst_4 = arith.constant 0.000000e+00 : f32
    %5 = vector.broadcast %cst_4 : f32 to vector<8x32xf32>
    %6 = vector.extract_strided_slice %4 {offsets = [0, 0, 0], sizes = [1, 8, 16], strides = [1, 1, 1]} : vector<1x8x96xf32> to vector<1x8x16xf32>
    %7 = vector.extract_strided_slice %4 {offsets = [0, 0, 32], sizes = [1, 8, 16], strides = [1, 1, 1]} : vector<1x8x96xf32> to vector<1x8x16xf32>
    %8 = vector.extract_strided_slice %4 {offsets = [0, 0, 64], sizes = [1, 8, 16], strides = [1, 1, 1]} : vector<1x8x96xf32> to vector<1x8x16xf32>
    "tpu.trace_start"() <{level = 10 : i32, message = "bqd,bkd->bqk"}> : () -> ()
    %cst_5 = arith.constant dense<0.000000e+00> : vector<1x8x8xf32>
    %9 = tpu.matmul %6, %7, %cst_5 {dimension_numbers = #tpu.dot_dimension_numbers<[2], [2], [1], [1], [0, 0, 0, 1, 1, 1], [0], [0]>} : vector<1x8x16xf32>, vector<1x8x16xf32>, vector<1x8x8xf32> -> vector<1x8x8xf32>
    "tpu.trace_stop"() : () -> ()
    %cst_6 = arith.constant dense<0xFF800000> : vector<1x8xf32>
    %10 = vector.multi_reduction <maximumf>, %9, %cst_6 [2] : vector<1x8x8xf32> to vector<1x8xf32>
    %11 = vector.shape_cast %10 : vector<1x8xf32> to vector<1x8x1xf32>
    %12 = vector.broadcast %11 : vector<1x8x1xf32> to vector<1x8x8xf32>
    %13 = arith.subf %9, %12 : vector<1x8x8xf32>
    %14 = math.exp %13 : vector<1x8x8xf32>
    %cst_7 = arith.constant dense<0.000000e+00> : vector<1x8xf32>
    %15 = vector.multi_reduction <add>, %14, %cst_7 [2] : vector<1x8x8xf32> to vector<1x8xf32>
    %16 = vector.shape_cast %15 : vector<1x8xf32> to vector<1x8x1xf32>
    %cst_8 = arith.constant 1.000000e+00 : f32
    %17 = vector.broadcast %cst_8 : f32 to vector<1x8x1xf32>
    %18 = arith.divf %17, %16 : vector<1x8x1xf32>
    %19 = vector.broadcast %18 : vector<1x8x1xf32> to vector<1x8x8xf32>
    %20 = arith.mulf %14, %19 : vector<1x8x8xf32>
    %c0_9 = arith.constant 0 : index
    %c0_10 = arith.constant 0 : index
    %c0_11 = arith.constant 0 : index
    %c0_12 = arith.constant 0 : index
    %21 = vector.load %arg13[%c0_9, %c0_10, %c0_11, %c0_12] : memref<1x2x8x8xf32, #tpu.memory_space<vmem>>, vector<1x1x8x8xf32>
    %22 = vector.shape_cast %21 : vector<1x1x8x8xf32> to vector<1x8x8xf32>
    %23 = vector.shape_cast %20 : vector<1x8x8xf32> to vector<1x1x8x8xf32>
    tpu.vector_store %arg13[%c0_9, %c0_10, %c0_11, %c0_12], %23 {strides = array<i32>} : memref<1x2x8x8xf32, #tpu.memory_space<vmem>>, vector<1x1x8x8xf32>,
    "tpu.trace_start"() <{level = 10 : i32, message = "bqk,bkd->bqd"}> : () -> ()
    %cst_13 = arith.constant dense<0.000000e+00> : vector<1x8x16xf32>
    %24 = tpu.matmul %14, %8, %cst_13 {dimension_numbers = #tpu.dot_dimension_numbers<[2], [1], [1], [2], [0, 0, 0, 1, 1, 2], [0], [0]>} : vector<1x8x8xf32>, vector<1x8x16xf32>, vector<1x8x16xf32> -> vector<1x8x16xf32>
    "tpu.trace_stop"() : () -> ()
    %25 = tpu.reciprocal %16 {approx = true} : vector<1x8x1xf32> -> vector<1x8x1xf32>
    %26 = vector.broadcast %25 : vector<1x8x1xf32> to vector<1x8x16xf32>
    %27 = arith.mulf %24, %26 : vector<1x8x16xf32>
    %28 = vector.shape_cast %27 : vector<1x8x16xf32> to vector<8x16xf32>
    %c0_14 = arith.constant 0 : index
    %c0_15 = arith.constant 0 : index
    %c0_16 = arith.constant 0 : index
    %29 = vector.load %arg3[%c0_14, %c0_15, %c0_16] : memref<2x16x32xf32, #tpu.memory_space<vmem>>, vector<1x16x32xf32>
    %30 = vector.shape_cast %29 : vector<1x16x32xf32> to vector<16x32xf32>
    %cst_17 = arith.constant dense<0.000000e+00> : vector<8x32xf32>
    %31 = tpu.matmul %28, %30, %cst_17 {dimension_numbers = #tpu.dot_dimension_numbers<[1], [0], [0], [1], [0, 0, 1, 1], [], []>} : vector<8x16xf32>, vector<16x32xf32>, vector<8x32xf32> -> vector<8x32xf32>
    %32 = arith.addf %5, %31 : vector<8x32xf32>
    %33 = vector.extract_strided_slice %4 {offsets = [0, 0, 16], sizes = [1, 8, 16], strides = [1, 1, 1]} : vector<1x8x96xf32> to vector<1x8x16xf32>
    %34 = vector.extract_strided_slice %4 {offsets = [0, 0, 48], sizes = [1, 8, 16], strides = [1, 1, 1]} : vector<1x8x96xf32> to vector<1x8x16xf32>
    %35 = vector.extract_strided_slice %4 {offsets = [0, 0, 80], sizes = [1, 8, 16], strides = [1, 1, 1]} : vector<1x8x96xf32> to vector<1x8x16xf32>
    "tpu.trace_start"() <{level = 10 : i32, message = "bqd,bkd->bqk"}> : () -> ()
    %cst_18 = arith.constant dense<0.000000e+00> : vector<1x8x8xf32>
    %36 = tpu.matmul %33, %34, %cst_18 {dimension_numbers = #tpu.dot_dimension_numbers<[2], [2], [1], [1], [0, 0, 0, 1, 1, 1], [0], [0]>} : vector<1x8x16xf32>, vector<1x8x16xf32>, vector<1x8x8xf32> -> vector<1x8x8xf32>
    "tpu.trace_stop"() : () -> ()
    %cst_19 = arith.constant dense<0xFF800000> : vector<1x8xf32>
    %37 = vector.multi_reduction <maximumf>, %36, %cst_19 [2] : vector<1x8x8xf32> to vector<1x8xf32>
    %38 = vector.shape_cast %37 : vector<1x8xf32> to vector<1x8x1xf32>
    %39 = vector.broadcast %38 : vector<1x8x1xf32> to vector<1x8x8xf32>
    %40 = arith.subf %36, %39 : vector<1x8x8xf32>
    %41 = math.exp %40 : vector<1x8x8xf32>
    %cst_20 = arith.constant dense<0.000000e+00> : vector<1x8xf32>
    %42 = vector.multi_reduction <add>, %41, %cst_20 [2] : vector<1x8x8xf32> to vector<1x8xf32>
    %43 = vector.shape_cast %42 : vector<1x8xf32> to vector<1x8x1xf32>
    %cst_21 = arith.constant 1.000000e+00 : f32
    %44 = vector.broadcast %cst_21 : f32 to vector<1x8x1xf32>
    %45 = arith.divf %44, %43 : vector<1x8x1xf32>
    %46 = vector.broadcast %45 : vector<1x8x1xf32> to vector<1x8x8xf32>
    %47 = arith.mulf %41, %46 : vector<1x8x8xf32>
    %c0_22 = arith.constant 0 : index
    %c1 = arith.constant 1 : index
    %c0_23 = arith.constant 0 : index
    %c0_24 = arith.constant 0 : index
    %48 = vector.load %arg13[%c0_22, %c1, %c0_23, %c0_24] : memref<1x2x8x8xf32, #tpu.memory_space<vmem>>, vector<1x1x8x8xf32>
    %49 = vector.shape_cast %48 : vector<1x1x8x8xf32> to vector<1x8x8xf32>
    %50 = vector.shape_cast %47 : vector<1x8x8xf32> to vector<1x1x8x8xf32>
    tpu.vector_store %arg13[%c0_22, %c1, %c0_23, %c0_24], %50 {strides = array<i32>} : memref<1x2x8x8xf32, #tpu.memory_space<vmem>>, vector<1x1x8x8xf32>,
    "tpu.trace_start"() <{level = 10 : i32, message = "bqk,bkd->bqd"}> : () -> ()
    %cst_25 = arith.constant dense<0.000000e+00> : vector<1x8x16xf32>
    %51 = tpu.matmul %41, %35, %cst_25 {dimension_numbers = #tpu.dot_dimension_numbers<[2], [1], [1], [2], [0, 0, 0, 1, 1, 2], [0], [0]>} : vector<1x8x8xf32>, vector<1x8x16xf32>, vector<1x8x16xf32> -> vector<1x8x16xf32>
    "tpu.trace_stop"() : () -> ()
    %52 = tpu.reciprocal %43 {approx = true} : vector<1x8x1xf32> -> vector<1x8x1xf32>
    %53 = vector.broadcast %52 : vector<1x8x1xf32> to vector<1x8x16xf32>
    %54 = arith.mulf %51, %53 : vector<1x8x16xf32>
    %55 = vector.shape_cast %54 : vector<1x8x16xf32> to vector<8x16xf32>
    %c1_26 = arith.constant 1 : index
    %c0_27 = arith.constant 0 : index
    %c0_28 = arith.constant 0 : index
    %56 = vector.load %arg3[%c1_26, %c0_27, %c0_28] : memref<2x16x32xf32, #tpu.memory_space<vmem>>, vector<1x16x32xf32>
    %57 = vector.shape_cast %56 : vector<1x16x32xf32> to vector<16x32xf32>
    %cst_29 = arith.constant dense<0.000000e+00> : vector<8x32xf32>
    %58 = tpu.matmul %55, %57, %cst_29 {dimension_numbers = #tpu.dot_dimension_numbers<[1], [0], [0], [1], [0, 0, 1, 1], [], []>} : vector<8x16xf32>, vector<16x32xf32>, vector<8x32xf32> -> vector<8x32xf32>
    %59 = arith.addf %32, %58 : vector<8x32xf32>
    %60 = arith.addf %59, %1 : vector<8x32xf32>
    %cst_30 = arith.constant dense<0.000000e+00> : vector<8xf32>
    %61 = vector.multi_reduction <add>, %60, %cst_30 [1] : vector<8x32xf32> to vector<8xf32>
    %62 = vector.shape_cast %61 : vector<8xf32> to vector<8x1xf32>
    %cst_31 = arith.constant 3.200000e+01 : f32
    %63 = vector.broadcast %cst_31 : f32 to vector<8x1xf32>
    %64 = arith.divf %62, %63 : vector<8x1xf32>
    %65 = vector.broadcast %64 : vector<8x1xf32> to vector<8x32xf32>
    %66 = arith.subf %60, %65 : vector<8x32xf32>
    %67 = arith.mulf %66, %66 : vector<8x32xf32>
    %cst_32 = arith.constant dense<0.000000e+00> : vector<8xf32>
    %68 = vector.multi_reduction <add>, %67, %cst_32 [1] : vector<8x32xf32> to vector<8xf32>
    %69 = vector.shape_cast %68 : vector<8xf32> to vector<8x1xf32>
    %cst_33 = arith.constant 3.200000e+01 : f32
    %70 = vector.broadcast %cst_33 : f32 to vector<8x1xf32>
    %71 = arith.divf %69, %70 : vector<8x1xf32>
    %72 = vector.broadcast %64 : vector<8x1xf32> to vector<8x32xf32>
    %73 = arith.subf %60, %72 : vector<8x32xf32>
    %cst_34 = arith.constant 9.99999997E-7 : f32
    %74 = vector.broadcast %cst_34 : f32 to vector<8x1xf32>
    %75 = arith.addf %71, %74 : vector<8x1xf32>
    %76 = math.rsqrt %75 : vector<8x1xf32>
    %77 = vector.broadcast %76 : vector<8x1xf32> to vector<8x32xf32>
    %78 = arith.mulf %73, %77 : vector<8x32xf32>
    %c0_35 = arith.constant 0 : index
    %c0_36 = arith.constant 0 : index
    %79 = vector.load %arg4[%c0_35, %c0_36] : memref<1x32xf32, #tpu.memory_space<vmem>>, vector<1x32xf32>
    %80 = vector.broadcast %79 : vector<1x32xf32> to vector<8x32xf32>
    %81 = arith.mulf %78, %80 : vector<8x32xf32>
    %c0_37 = arith.constant 0 : index
    %c0_38 = arith.constant 0 : index
    %82 = vector.load %arg5[%c0_37, %c0_38] : memref<1x32xf32, #tpu.memory_space<vmem>>, vector<1x32xf32>
    %83 = vector.broadcast %82 : vector<1x32xf32> to vector<8x32xf32>
    %84 = arith.addf %81, %83 : vector<8x32xf32>
    %c0_39 = arith.constant 0 : index
    %c0_40 = arith.constant 0 : index
    %85 = vector.load %arg6[%c0_39, %c0_40] : memref<32x64xf32, #tpu.memory_space<vmem>>, vector<32x64xf32>
    %cst_41 = arith.constant dense<0.000000e+00> : vector<8x64xf32>
    %86 = tpu.matmul %84, %85, %cst_41 {dimension_numbers = #tpu.dot_dimension_numbers<[1], [0], [0], [1], [0, 0, 1, 1], [], []>} : vector<8x32xf32>, vector<32x64xf32>, vector<8x64xf32> -> vector<8x64xf32>
    %c0_42 = arith.constant 0 : index
    %c0_43 = arith.constant 0 : index
    %87 = vector.load %arg7[%c0_42, %c0_43] : memref<1x64xf32, #tpu.memory_space<vmem>>, vector<1x64xf32>
    %88 = vector.broadcast %87 : vector<1x64xf32> to vector<8x64xf32>
    %89 = arith.addf %86, %88 : vector<8x64xf32>
    %cst_44 = arith.constant 0.000000e+00 : f32
    %90 = vector.broadcast %cst_44 : f32 to vector<8x64xf32>
    %91 = arith.maximumf %89, %90 : vector<8x64xf32>
    %c0_45 = arith.constant 0 : index
    %c0_46 = arith.constant 0 : index
    %92 = vector.load %arg8[%c0_45, %c0_46] : memref<64x32xf32, #tpu.memory_space<vmem>>, vector<64x32xf32>
    %cst_47 = arith.constant dense<0.000000e+00> : vector<8x32xf32>
    %93 = tpu.matmul %91, %92, %cst_47 {dimension_numbers = #tpu.dot_dimension_numbers<[1], [0], [0], [1], [0, 0, 1, 1], [], []>} : vector<8x64xf32>, vector<64x32xf32>, vector<8x32xf32> -> vector<8x32xf32>
    %c0_48 = arith.constant 0 : index
    %c0_49 = arith.constant 0 : index
    %94 = vector.load %arg9[%c0_48, %c0_49] : memref<1x32xf32, #tpu.memory_space<vmem>>, vector<1x32xf32>
    %95 = vector.broadcast %94 : vector<1x32xf32> to vector<8x32xf32>
    %96 = arith.addf %93, %95 : vector<8x32xf32>
    %97 = arith.addf %96, %84 : vector<8x32xf32>
    %cst_50 = arith.constant dense<0.000000e+00> : vector<8xf32>
    %98 = vector.multi_reduction <add>, %97, %cst_50 [1] : vector<8x32xf32> to vector<8xf32>
    %99 = vector.shape_cast %98 : vector<8xf32> to vector<8x1xf32>
    %cst_51 = arith.constant 3.200000e+01 : f32
    %100 = vector.broadcast %cst_51 : f32 to vector<8x1xf32>
    %101 = arith.divf %99, %100 : vector<8x1xf32>
    %102 = vector.broadcast %101 : vector<8x1xf32> to vector<8x32xf32>
    %103 = arith.subf %97, %102 : vector<8x32xf32>
    %104 = arith.mulf %103, %103 : vector<8x32xf32>
    %cst_52 = arith.constant dense<0.000000e+00> : vector<8xf32>
    %105 = vector.multi_reduction <add>, %104, %cst_52 [1] : vector<8x32xf32> to vector<8xf32>
    %106 = vector.shape_cast %105 : vector<8xf32> to vector<8x1xf32>
    %cst_53 = arith.constant 3.200000e+01 : f32
    %107 = vector.broadcast %cst_53 : f32 to vector<8x1xf32>
    %108 = arith.divf %106, %107 : vector<8x1xf32>
    %109 = vector.broadcast %101 : vector<8x1xf32> to vector<8x32xf32>
    %110 = arith.subf %97, %109 : vector<8x32xf32>
    %cst_54 = arith.constant 9.99999997E-7 : f32
    %111 = vector.broadcast %cst_54 : f32 to vector<8x1xf32>
    %112 = arith.addf %108, %111 : vector<8x1xf32>
    %113 = math.rsqrt %112 : vector<8x1xf32>
    %114 = vector.broadcast %113 : vector<8x1xf32> to vector<8x32xf32>
    %115 = arith.mulf %110, %114 : vector<8x32xf32>
    %c0_55 = arith.constant 0 : index
    %c0_56 = arith.constant 0 : index
    %116 = vector.load %arg10[%c0_55, %c0_56] : memref<1x32xf32, #tpu.memory_space<vmem>>, vector<1x32xf32>
    %117 = vector.broadcast %116 : vector<1x32xf32> to vector<8x32xf32>
    %118 = arith.mulf %115, %117 : vector<8x32xf32>
    %c0_57 = arith.constant 0 : index
    %c0_58 = arith.constant 0 : index
    %119 = vector.load %arg11[%c0_57, %c0_58] : memref<1x32xf32, #tpu.memory_space<vmem>>, vector<1x32xf32>
    %120 = vector.broadcast %119 : vector<1x32xf32> to vector<8x32xf32>
    %121 = arith.addf %118, %120 : vector<8x32xf32>
    %122 = vector.shape_cast %121 : vector<8x32xf32> to vector<1x8x32xf32>
    %c0_59 = arith.constant 0 : index
    %c0_60 = arith.constant 0 : index
    %c0_61 = arith.constant 0 : index
    %123 = vector.load %arg12[%c0_59, %c0_60, %c0_61] : memref<1x8x32xf32, #tpu.memory_space<vmem>>, vector<1x8x32xf32>
    tpu.vector_store %arg12[%c0_59, %c0_60, %c0_61], %122 {strides = array<i32>} : memref<1x8x32xf32, #tpu.memory_space<vmem>>, vector<1x8x32xf32>,
    return
  }
  func.func @transform_0(%arg0: i32) -> (i32, i32, i32) {
    %c0_i32 = arith.constant 0 : i32
    %c0_i32_0 = arith.constant 0 : i32
    %c0_i32_1 = arith.constant 0 : i32
    return %arg0, %c0_i32, %c0_i32_0 : i32, i32, i32
  }
  func.func @transform_1(%arg0: i32) -> (i32, i32) {
    %c0_i32 = arith.constant 0 : i32
    %c0_i32_0 = arith.constant 0 : i32
    %c0_i32_1 = arith.constant 0 : i32
    return %c0_i32, %c0_i32_0 : i32, i32
  }
  func.func @transform_2(%arg0: i32) -> (i32, i32, i32) {
    %c0_i32 = arith.constant 0 : i32
    %c0_i32_0 = arith.constant 0 : i32
    %c0_i32_1 = arith.constant 0 : i32
    %c0_i32_2 = arith.constant 0 : i32
    return %c0_i32, %c0_i32_0, %c0_i32_1 : i32, i32, i32
  }
  func.func @transform_3(%arg0: i32) -> (i32, i32) {
    %c0_i32 = arith.constant 0 : i32
    %c0_i32_0 = arith.constant 0 : i32
    %c0_i32_1 = arith.constant 0 : i32
    return %c0_i32, %c0_i32_0 : i32, i32
  }
  func.func @transform_4(%arg0: i32) -> (i32, i32) {
    %c0_i32 = arith.constant 0 : i32
    %c0_i32_0 = arith.constant 0 : i32
    %c0_i32_1 = arith.constant 0 : i32
    return %c0_i32, %c0_i32_0 : i32, i32
  }
  func.func @transform_5(%arg0: i32) -> (i32, i32) {
    %c0_i32 = arith.constant 0 : i32
    %c0_i32_0 = arith.constant 0 : i32
    %c0_i32_1 = arith.constant 0 : i32
    return %c0_i32, %c0_i32_0 : i32, i32
  }
  func.func @transform_6(%arg0: i32) -> (i32, i32) {
    %c0_i32 = arith.constant 0 : i32
    %c0_i32_0 = arith.constant 0 : i32
    %c0_i32_1 = arith.constant 0 : i32
    return %c0_i32, %c0_i32_0 : i32, i32
  }
  func.func @transform_7(%arg0: i32) -> (i32, i32) {
    %c0_i32 = arith.constant 0 : i32
    %c0_i32_0 = arith.constant 0 : i32
    %c0_i32_1 = arith.constant 0 : i32
    return %c0_i32, %c0_i32_0 : i32, i32
  }
  func.func @transform_8(%arg0: i32) -> (i32, i32) {
    %c0_i32 = arith.constant 0 : i32
    %c0_i32_0 = arith.constant 0 : i32
    %c0_i32_1 = arith.constant 0 : i32
    return %c0_i32, %c0_i32_0 : i32, i32
  }
  func.func @transform_9(%arg0: i32) -> (i32, i32) {
    %c0_i32 = arith.constant 0 : i32
    %c0_i32_0 = arith.constant 0 : i32
    %c0_i32_1 = arith.constant 0 : i32
    return %c0_i32, %c0_i32_0 : i32, i32
  }
  func.func @transform_10(%arg0: i32) -> (i32, i32) {
    %c0_i32 = arith.constant 0 : i32
    %c0_i32_0 = arith.constant 0 : i32
    %c0_i32_1 = arith.constant 0 : i32
    return %c0_i32, %c0_i32_0 : i32, i32
  }
  func.func @transform_11(%arg0: i32) -> (i32, i32, i32) {
    %c0_i32 = arith.constant 0 : i32
    %c0_i32_0 = arith.constant 0 : i32
    %c0_i32_1 = arith.constant 0 : i32
    return %arg0, %c0_i32, %c0_i32_0 : i32, i32, i32
  }
  func.func @transform_12(%arg0: i32) -> (i32, i32, i32, i32) {
    %c0_i32 = arith.constant 0 : i32
    %c0_i32_0 = arith.constant 0 : i32
    %c0_i32_1 = arith.constant 0 : i32
    %c0_i32_2 = arith.constant 0 : i32
    return %arg0, %c0_i32, %c0_i32_0, %c0_i32_1 : i32, i32, i32, i32
  }
}

module attributes {stable_mosaic.version = 11 : i64} {
  func.func @_encoder_layer_kernel(%arg0: i32, %arg1: memref<1x8x32xf32, #tpu.memory_space<vmem>>, %arg2: memref<32x96xf32, #tpu.memory_space<vmem>>, %arg3: memref<2x16x32xf32, #tpu.memory_space<vmem>>, %arg4: memref<1x32xf32, #tpu.memory_space<vmem>>, %arg5: memref<1x32xf32, #tpu.memory_space<vmem>>, %arg6: memref<32x64xf32, #tpu.memory_space<vmem>>, %arg7: memref<1x64xf32, #tpu.memory_space<vmem>>, %arg8: memref<64x32xf32, #tpu.memory_space<vmem>>, %arg9: memref<1x32xf32, #tpu.memory_space<vmem>>, %arg10: memref<1x32xf32, #tpu.memory_space<vmem>>, %arg11: memref<1x32xf32, #tpu.memory_space<vmem>>, %arg12: memref<1x8x32xf32, #tpu.memory_space<vmem>>, %arg13: memref<1x2x8x8xf32, #tpu.memory_space<vmem>>) attributes {dimension_semantics = [#tpu.dimension_semantics<parallel>], iteration_bounds = array<i64: 2>, scalar_prefetch = 0 : i64, scratch_operands = 0 : i64, tpu.core_type = #tpu.core_type<tc>, window_params = [{transform_indices = @transform_0, window_bounds = array<i64: 1, 8, 32>}, {pipeline_mode = #tpu.pipeline_mode<synchronous>, transform_indices = @transform_1, window_bounds = array<i64: 32, 96>}, {pipeline_mode = #tpu.pipeline_mode<synchronous>, transform_indices = @transform_2, window_bounds = array<i64: 2, 16, 32>}, {pipeline_mode = #tpu.pipeline_mode<synchronous>, transform_indices = @transform_3, window_bounds = array<i64: 1, 32>}, {pipeline_mode = #tpu.pipeline_mode<synchronous>, transform_indices = @transform_4, window_bounds = array<i64: 1, 32>}, {pipeline_mode = #tpu.pipeline_mode<synchronous>, transform_indices = @transform_5, window_bounds = array<i64: 32, 64>}, {pipeline_mode = #tpu.pipeline_mode<synchronous>, transform_indices = @transform_6, window_bounds = array<i64: 1, 64>}, {pipeline_mode = #tpu.pipeline_mode<synchronous>, transform_indices = @transform_7, window_bounds = array<i64: 64, 32>}, {pipeline_mode = #tpu.pipeline_mode<synchronous>, transform_indices = @transform_8, window_bounds = array<i64: 1, 32>}, {pipeline_mode = #tpu.pipeline_mode<synchronous>, transform_indices = @transform_9, window_bounds = array<i64: 1, 32>}, {pipeline_mode = #tpu.pipeline_mode<synchronous>, transform_indices = @transform_10, window_bounds = array<i64: 1, 32>}, {transform_indices = @transform_11, window_bounds = array<i64: 1, 8, 32>}, {transform_indices = @transform_12, window_bounds = array<i64: 1, 2, 8, 8>}]} {
    %c0 = arith.constant 0 : index
    %c0_0 = arith.constant 0 : index
    %c0_1 = arith.constant 0 : index
    %0 = vector.load %arg1[%c0, %c0_0, %c0_1] : memref<1x8x32xf32, #tpu.memory_space<vmem>>, vector<1x8x32xf32>
    %1 = vector.shape_cast %0 : vector<1x8x32xf32> to vector<8x32xf32>
    %c0_2 = arith.constant 0 : index
    %c0_3 = arith.constant 0 : index
    %2 = vector.load %arg2[%c0_2, %c0_3] : memref<32x96xf32, #tpu.memory_space<vmem>>, vector<32x96xf32>
    %cst = arith.constant dense<0.000000e+00> : vector<8x96xf32>
    %3 = tpu.matmul %1, %2, %cst {dimension_numbers = #tpu.dot_dimension_numbers<[1], [0], [0], [1], [0, 0, 1, 1], [], []>} : vector<8x32xf32>, vector<32x96xf32>, vector<8x96xf32> -> vector<8x96xf32>
    %4 = vector.shape_cast %3 : vector<8x96xf32> to vector<1x8x96xf32>
    %cst_4 = arith.constant 0.000000e+00 : f32
    %5 = vector.broadcast %cst_4 : f32 to vector<8x32xf32>
    %6 = vector.extract_strided_slice %4 {offsets = [0, 0, 0], sizes = [1, 8, 16], strides = [1, 1, 1]} : vector<1x8x96xf32> to vector<1x8x16xf32>
    %7 = vector.extract_strided_slice %4 {offsets = [0, 0, 32], sizes = [1, 8, 16], strides = [1, 1, 1]} : vector<1x8x96xf32> to vector<1x8x16xf32>
    %8 = vector.extract_strided_slice %4 {offsets = [0, 0, 64], sizes = [1, 8, 16], strides = [1, 1, 1]} : vector<1x8x96xf32> to vector<1x8x16xf32>
    "tpu.trace_start"() <{level = 10 : i32, message = "bqd,bkd->bqk"}> : () -> ()
    %cst_5 = arith.constant dense<0.000000e+00> : vector<1x8x8xf32>
    %9 = tpu.matmul %6, %7, %cst_5 {dimension_numbers = #tpu.dot_dimension_numbers<[2], [2], [1], [1], [0, 0, 0, 1, 1, 1], [0], [0]>} : vector<1x8x16xf32>, vector<1x8x16xf32>, vector<1x8x8xf32> -> vector<1x8x8xf32>
    "tpu.trace_stop"() : () -> ()
    %cst_6 = arith.constant dense<0xFF800000> : vector<1x8xf32>
    %10 = vector.multi_reduction <maximumf>, %9, %cst_6 [2] : vector<1x8x8xf32> to vector<1x8xf32>
    %11 = vector.shape_cast %10 : vector<1x8xf32> to vector<1x8x1xf32>
    %12 = vector.broadcast %11 : vector<1x8x1xf32> to vector<1x8x8xf32>
    %13 = arith.subf %9, %12 : vector<1x8x8xf32>
    %14 = math.exp %13 : vector<1x8x8xf32>
    %cst_7 = arith.constant dense<0.000000e+00> : vector<1x8xf32>
    %15 = vector.multi_reduction <add>, %14, %cst_7 [2] : vector<1x8x8xf32> to vector<1x8xf32>
    %16 = vector.shape_cast %15 : vector<1x8xf32> to vector<1x8x1xf32>
    %cst_8 = arith.constant 1.000000e+00 : f32
    %17 = vector.broadcast %cst_8 : f32 to vector<1x8x1xf32>
    %18 = arith.divf %17, %16 : vector<1x8x1xf32>
    %19 = vector.broadcast %18 : vector<1x8x1xf32> to vector<1x8x8xf32>
    %20 = arith.mulf %14, %19 : vector<1x8x8xf32>
    %c0_9 = arith.constant 0 : index
    %c0_10 = arith.constant 0 : index
    %c0_11 = arith.constant 0 : index
    %c0_12 = arith.constant 0 : index
    %21 = vector.load %arg13[%c0_9, %c0_10, %c0_11, %c0_12] : memref<1x2x8x8xf32, #tpu.memory_space<vmem>>, vector<1x1x8x8xf32>
    %22 = vector.shape_cast %21 : vector<1x1x8x8xf32> to vector<1x8x8xf32>
    %23 = vector.shape_cast %20 : vector<1x8x8xf32> to vector<1x1x8x8xf32>
    tpu.vector_store %arg13[%c0_9, %c0_10, %c0_11, %c0_12], %23 {strides = array<i32>} : memref<1x2x8x8xf32, #tpu.memory_space<vmem>>, vector<1x1x8x8xf32>,
    "tpu.trace_start"() <{level = 10 : i32, message = "bqk,bkd->bqd"}> : () -> ()
    %cst_13 = arith.constant dense<0.000000e+00> : vector<1x8x16xf32>
    %24 = tpu.matmul %14, %8, %cst_13 {dimension_numbers = #tpu.dot_dimension_numbers<[2], [1], [1], [2], [0, 0, 0, 1, 1, 2], [0], [0]>} : vector<1x8x8xf32>, vector<1x8x16xf32>, vector<1x8x16xf32> -> vector<1x8x16xf32>
    "tpu.trace_stop"() : () -> ()
    %25 = tpu.reciprocal %16 {approx = true} : vector<1x8x1xf32> -> vector<1x8x1xf32>
    %26 = vector.broadcast %25 : vector<1x8x1xf32> to vector<1x8x16xf32>
    %27 = arith.mulf %24, %26 : vector<1x8x16xf32>
    %28 = vector.shape_cast %27 : vector<1x8x16xf32> to vector<8x16xf32>
    %c0_14 = arith.constant 0 : index
    %c0_15 = arith.constant 0 : index
    %c0_16 = arith.constant 0 : index
    %29 = vector.load %arg3[%c0_14, %c0_15, %c0_16] : memref<2x16x32xf32, #tpu.memory_space<vmem>>, vector<1x16x32xf32>
    %30 = vector.shape_cast %29 : vector<1x16x32xf32> to vector<16x32xf32>
    %cst_17 = arith.constant dense<0.000000e+00> : vector<8x32xf32>
    %31 = tpu.matmul %28, %30, %cst_17 {dimension_numbers = #tpu.dot_dimension_numbers<[1], [0], [0], [1], [0, 0, 1, 1], [], []>} : vector<8x16xf32>, vector<16x32xf32>, vector<8x32xf32> -> vector<8x32xf32>
    %32 = arith.addf %5, %31 : vector<8x32xf32>
    %33 = vector.extract_strided_slice %4 {offsets = [0, 0, 16], sizes = [1, 8, 16], strides = [1, 1, 1]} : vector<1x8x96xf32> to vector<1x8x16xf32>
    %34 = vector.extract_strided_slice %4 {offsets = [0, 0, 48], sizes = [1, 8, 16], strides = [1, 1, 1]} : vector<1x8x96xf32> to vector<1x8x16xf32>
    %35 = vector.extract_strided_slice %4 {offsets = [0, 0, 80], sizes = [1, 8, 16], strides = [1, 1, 1]} : vector<1x8x96xf32> to vector<1x8x16xf32>
    "tpu.trace_start"() <{level = 10 : i32, message = "bqd,bkd->bqk"}> : () -> ()
    %cst_18 = arith.constant dense<0.000000e+00> : vector<1x8x8xf32>
    %36 = tpu.matmul %33, %34, %cst_18 {dimension_numbers = #tpu.dot_dimension_numbers<[2], [2], [1], [1], [0, 0, 0, 1, 1, 1], [0], [0]>} : vector<1x8x16xf32>, vector<1x8x16xf32>, vector<1x8x8xf32> -> vector<1x8x8xf32>
    "tpu.trace_stop"() : () -> ()
    %cst_19 = arith.constant dense<0xFF800000> : vector<1x8xf32>
    %37 = vector.multi_reduction <maximumf>, %36, %cst_19 [2] : vector<1x8x8xf32> to vector<1x8xf32>
    %38 = vector.shape_cast %37 : vector<1x8xf32> to vector<1x8x1xf32>
    %39 = vector.broadcast %38 : vector<1x8x1xf32> to vector<1x8x8xf32>
    %40 = arith.subf %36, %39 : vector<1x8x8xf32>
    %41 = math.exp %40 : vector<1x8x8xf32>
    %cst_20 = arith.constant dense<0.000000e+00> : vector<1x8xf32>
    %42 = vector.multi_reduction <add>, %41, %cst_20 [2] : vector<1x8x8xf32> to vector<1x8xf32>
    %43 = vector.shape_cast %42 : vector<1x8xf32> to vector<1x8x1xf32>
    %cst_21 = arith.constant 1.000000e+00 : f32
    %44 = vector.broadcast %cst_21 : f32 to vector<1x8x1xf32>
    %45 = arith.divf %44, %43 : vector<1x8x1xf32>
    %46 = vector.broadcast %45 : vector<1x8x1xf32> to vector<1x8x8xf32>
    %47 = arith.mulf %41, %46 : vector<1x8x8xf32>
    %c0_22 = arith.constant 0 : index
    %c1 = arith.constant 1 : index
    %c0_23 = arith.constant 0 : index
    %c0_24 = arith.constant 0 : index
    %48 = vector.load %arg13[%c0_22, %c1, %c0_23, %c0_24] : memref<1x2x8x8xf32, #tpu.memory_space<vmem>>, vector<1x1x8x8xf32>
    %49 = vector.shape_cast %48 : vector<1x1x8x8xf32> to vector<1x8x8xf32>
    %50 = vector.shape_cast %47 : vector<1x8x8xf32> to vector<1x1x8x8xf32>
    tpu.vector_store %arg13[%c0_22, %c1, %c0_23, %c0_24], %50 {strides = array<i32>} : memref<1x2x8x8xf32, #tpu.memory_space<vmem>>, vector<1x1x8x8xf32>,
    "tpu.trace_start"() <{level = 10 : i32, message = "bqk,bkd->bqd"}> : () -> ()
    %cst_25 = arith.constant dense<0.000000e+00> : vector<1x8x16xf32>
    %51 = tpu.matmul %41, %35, %cst_25 {dimension_numbers = #tpu.dot_dimension_numbers<[2], [1], [1], [2], [0, 0, 0, 1, 1, 2], [0], [0]>} : vector<1x8x8xf32>, vector<1x8x16xf32>, vector<1x8x16xf32> -> vector<1x8x16xf32>
    "tpu.trace_stop"() : () -> ()
    %52 = tpu.reciprocal %43 {approx = true} : vector<1x8x1xf32> -> vector<1x8x1xf32>
    %53 = vector.broadcast %52 : vector<1x8x1xf32> to vector<1x8x16xf32>
    %54 = arith.mulf %51, %53 : vector<1x8x16xf32>
    %55 = vector.shape_cast %54 : vector<1x8x16xf32> to vector<8x16xf32>
    %c1_26 = arith.constant 1 : index
    %c0_27 = arith.constant 0 : index
    %c0_28 = arith.constant 0 : index
    %56 = vector.load %arg3[%c1_26, %c0_27, %c0_28] : memref<2x16x32xf32, #tpu.memory_space<vmem>>, vector<1x16x32xf32>
    %57 = vector.shape_cast %56 : vector<1x16x32xf32> to vector<16x32xf32>
    %cst_29 = arith.constant dense<0.000000e+00> : vector<8x32xf32>
    %58 = tpu.matmul %55, %57, %cst_29 {dimension_numbers = #tpu.dot_dimension_numbers<[1], [0], [0], [1], [0, 0, 1, 1], [], []>} : vector<8x16xf32>, vector<16x32xf32>, vector<8x32xf32> -> vector<8x32xf32>
    %59 = arith.addf %32, %58 : vector<8x32xf32>
    %60 = arith.addf %59, %1 : vector<8x32xf32>
    %cst_30 = arith.constant dense<0.000000e+00> : vector<8xf32>
    %61 = vector.multi_reduction <add>, %60, %cst_30 [1] : vector<8x32xf32> to vector<8xf32>
    %62 = vector.shape_cast %61 : vector<8xf32> to vector<8x1xf32>
    %cst_31 = arith.constant 3.200000e+01 : f32
    %63 = vector.broadcast %cst_31 : f32 to vector<8x1xf32>
    %64 = arith.divf %62, %63 : vector<8x1xf32>
    %65 = vector.broadcast %64 : vector<8x1xf32> to vector<8x32xf32>
    %66 = arith.subf %60, %65 : vector<8x32xf32>
    %67 = arith.mulf %66, %66 : vector<8x32xf32>
    %cst_32 = arith.constant dense<0.000000e+00> : vector<8xf32>
    %68 = vector.multi_reduction <add>, %67, %cst_32 [1] : vector<8x32xf32> to vector<8xf32>
    %69 = vector.shape_cast %68 : vector<8xf32> to vector<8x1xf32>
    %cst_33 = arith.constant 3.200000e+01 : f32
    %70 = vector.broadcast %cst_33 : f32 to vector<8x1xf32>
    %71 = arith.divf %69, %70 : vector<8x1xf32>
    %72 = vector.broadcast %64 : vector<8x1xf32> to vector<8x32xf32>
    %73 = arith.subf %60, %72 : vector<8x32xf32>
    %cst_34 = arith.constant 9.99999997E-7 : f32
    %74 = vector.broadcast %cst_34 : f32 to vector<8x1xf32>
    %75 = arith.addf %71, %74 : vector<8x1xf32>
    %76 = math.rsqrt %75 : vector<8x1xf32>
    %77 = vector.broadcast %76 : vector<8x1xf32> to vector<8x32xf32>
    %78 = arith.mulf %73, %77 : vector<8x32xf32>
    %c0_35 = arith.constant 0 : index
    %c0_36 = arith.constant 0 : index
    %79 = vector.load %arg4[%c0_35, %c0_36] : memref<1x32xf32, #tpu.memory_space<vmem>>, vector<1x32xf32>
    %80 = vector.broadcast %79 : vector<1x32xf32> to vector<8x32xf32>
    %81 = arith.mulf %78, %80 : vector<8x32xf32>
    %c0_37 = arith.constant 0 : index
    %c0_38 = arith.constant 0 : index
    %82 = vector.load %arg5[%c0_37, %c0_38] : memref<1x32xf32, #tpu.memory_space<vmem>>, vector<1x32xf32>
    %83 = vector.broadcast %82 : vector<1x32xf32> to vector<8x32xf32>
    %84 = arith.addf %81, %83 : vector<8x32xf32>
    %c0_39 = arith.constant 0 : index
    %c0_40 = arith.constant 0 : index
    %85 = vector.load %arg6[%c0_39, %c0_40] : memref<32x64xf32, #tpu.memory_space<vmem>>, vector<32x64xf32>
    %cst_41 = arith.constant dense<0.000000e+00> : vector<8x64xf32>
    %86 = tpu.matmul %84, %85, %cst_41 {dimension_numbers = #tpu.dot_dimension_numbers<[1], [0], [0], [1], [0, 0, 1, 1], [], []>} : vector<8x32xf32>, vector<32x64xf32>, vector<8x64xf32> -> vector<8x64xf32>
    %c0_42 = arith.constant 0 : index
    %c0_43 = arith.constant 0 : index
    %87 = vector.load %arg7[%c0_42, %c0_43] : memref<1x64xf32, #tpu.memory_space<vmem>>, vector<1x64xf32>
    %88 = vector.broadcast %87 : vector<1x64xf32> to vector<8x64xf32>
    %89 = arith.addf %86, %88 : vector<8x64xf32>
    %cst_44 = arith.constant 0.000000e+00 : f32
    %90 = vector.broadcast %cst_44 : f32 to vector<8x64xf32>
    %91 = arith.maximumf %89, %90 : vector<8x64xf32>
    %c0_45 = arith.constant 0 : index
    %c0_46 = arith.constant 0 : index
    %92 = vector.load %arg8[%c0_45, %c0_46] : memref<64x32xf32, #tpu.memory_space<vmem>>, vector<64x32xf32>
    %cst_47 = arith.constant dense<0.000000e+00> : vector<8x32xf32>
    %93 = tpu.matmul %91, %92, %cst_47 {dimension_numbers = #tpu.dot_dimension_numbers<[1], [0], [0], [1], [0, 0, 1, 1], [], []>} : vector<8x64xf32>, vector<64x32xf32>, vector<8x32xf32> -> vector<8x32xf32>
    %c0_48 = arith.constant 0 : index
    %c0_49 = arith.constant 0 : index
    %94 = vector.load %arg9[%c0_48, %c0_49] : memref<1x32xf32, #tpu.memory_space<vmem>>, vector<1x32xf32>
    %95 = vector.broadcast %94 : vector<1x32xf32> to vector<8x32xf32>
    %96 = arith.addf %93, %95 : vector<8x32xf32>
    %97 = arith.addf %96, %84 : vector<8x32xf32>
    %cst_50 = arith.constant dense<0.000000e+00> : vector<8xf32>
    %98 = vector.multi_reduction <add>, %97, %cst_50 [1] : vector<8x32xf32> to vector<8xf32>
    %99 = vector.shape_cast %98 : vector<8xf32> to vector<8x1xf32>
    %cst_51 = arith.constant 3.200000e+01 : f32
    %100 = vector.broadcast %cst_51 : f32 to vector<8x1xf32>
    %101 = arith.divf %99, %100 : vector<8x1xf32>
    %102 = vector.broadcast %101 : vector<8x1xf32> to vector<8x32xf32>
    %103 = arith.subf %97, %102 : vector<8x32xf32>
    %104 = arith.mulf %103, %103 : vector<8x32xf32>
    %cst_52 = arith.constant dense<0.000000e+00> : vector<8xf32>
    %105 = vector.multi_reduction <add>, %104, %cst_52 [1] : vector<8x32xf32> to vector<8xf32>
    %106 = vector.shape_cast %105 : vector<8xf32> to vector<8x1xf32>
    %cst_53 = arith.constant 3.200000e+01 : f32
    %107 = vector.broadcast %cst_53 : f32 to vector<8x1xf32>
    %108 = arith.divf %106, %107 : vector<8x1xf32>
    %109 = vector.broadcast %101 : vector<8x1xf32> to vector<8x32xf32>
    %110 = arith.subf %97, %109 : vector<8x32xf32>
    %cst_54 = arith.constant 9.99999997E-7 : f32
    %111 = vector.broadcast %cst_54 : f32 to vector<8x1xf32>
    %112 = arith.addf %108, %111 : vector<8x1xf32>
    %113 = math.rsqrt %112 : vector<8x1xf32>
    %114 = vector.broadcast %113 : vector<8x1xf32> to vector<8x32xf32>
    %115 = arith.mulf %110, %114 : vector<8x32xf32>
    %c0_55 = arith.constant 0 : index
    %c0_56 = arith.constant 0 : index
    %116 = vector.load %arg10[%c0_55, %c0_56] : memref<1x32xf32, #tpu.memory_space<vmem>>, vector<1x32xf32>
    %117 = vector.broadcast %116 : vector<1x32xf32> to vector<8x32xf32>
    %118 = arith.mulf %115, %117 : vector<8x32xf32>
    %c0_57 = arith.constant 0 : index
    %c0_58 = arith.constant 0 : index
    %119 = vector.load %arg11[%c0_57, %c0_58] : memref<1x32xf32, #tpu.memory_space<vmem>>, vector<1x32xf32>
    %120 = vector.broadcast %119 : vector<1x32xf32> to vector<8x32xf32>
    %121 = arith.addf %118, %120 : vector<8x32xf32>
    %122 = vector.shape_cast %121 : vector<8x32xf32> to vector<1x8x32xf32>
    %c0_59 = arith.constant 0 : index
    %c0_60 = arith.constant 0 : index
    %c0_61 = arith.constant 0 : index
    %123 = vector.load %arg12[%c0_59, %c0_60, %c0_61] : memref<1x8x32xf32, #tpu.memory_space<vmem>>, vector<1x8x32xf32>
    tpu.vector_store %arg12[%c0_59, %c0_60, %c0_61], %122 {strides = array<i32>} : memref<1x8x32xf32, #tpu.memory_space<vmem>>, vector<1x8x32xf32>,
    return
  }
  func.func @transform_0(%arg0: i32) -> (i32, i32, i32) {
    %c0_i32 = arith.constant 0 : i32
    %c0_i32_0 = arith.constant 0 : i32
    %c0_i32_1 = arith.constant 0 : i32
    return %arg0, %c0_i32, %c0_i32_0 : i32, i32, i32
  }
  func.func @transform_1(%arg0: i32) -> (i32, i32) {
    %c0_i32 = arith.constant 0 : i32
    %c0_i32_0 = arith.constant 0 : i32
    %c0_i32_1 = arith.constant 0 : i32
    return %c0_i32, %c0_i32_0 : i32, i32
  }
  func.func @transform_2(%arg0: i32) -> (i32, i32, i32) {
    %c0_i32 = arith.constant 0 : i32
    %c0_i32_0 = arith.constant 0 : i32
    %c0_i32_1 = arith.constant 0 : i32
    %c0_i32_2 = arith.constant 0 : i32
    return %c0_i32, %c0_i32_0, %c0_i32_1 : i32, i32, i32
  }
  func.func @transform_3(%arg0: i32) -> (i32, i32) {
    %c0_i32 = arith.constant 0 : i32
    %c0_i32_0 = arith.constant 0 : i32
    %c0_i32_1 = arith.constant 0 : i32
    return %c0_i32, %c0_i32_0 : i32, i32
  }
  func.func @transform_4(%arg0: i32) -> (i32, i32) {
    %c0_i32 = arith.constant 0 : i32
    %c0_i32_0 = arith.constant 0 : i32
    %c0_i32_1 = arith.constant 0 : i32
    return %c0_i32, %c0_i32_0 : i32, i32
  }
  func.func @transform_5(%arg0: i32) -> (i32, i32) {
    %c0_i32 = arith.constant 0 : i32
    %c0_i32_0 = arith.constant 0 : i32
    %c0_i32_1 = arith.constant 0 : i32
    return %c0_i32, %c0_i32_0 : i32, i32
  }
  func.func @transform_6(%arg0: i32) -> (i32, i32) {
    %c0_i32 = arith.constant 0 : i32
    %c0_i32_0 = arith.constant 0 : i32
    %c0_i32_1 = arith.constant 0 : i32
    return %c0_i32, %c0_i32_0 : i32, i32
  }
  func.func @transform_7(%arg0: i32) -> (i32, i32) {
    %c0_i32 = arith.constant 0 : i32
    %c0_i32_0 = arith.constant 0 : i32
    %c0_i32_1 = arith.constant 0 : i32
    return %c0_i32, %c0_i32_0 : i32, i32
  }
  func.func @transform_8(%arg0: i32) -> (i32, i32) {
    %c0_i32 = arith.constant 0 : i32
    %c0_i32_0 = arith.constant 0 : i32
    %c0_i32_1 = arith.constant 0 : i32
    return %c0_i32, %c0_i32_0 : i32, i32
  }
  func.func @transform_9(%arg0: i32) -> (i32, i32) {
    %c0_i32 = arith.constant 0 : i32
    %c0_i32_0 = arith.constant 0 : i32
    %c0_i32_1 = arith.constant 0 : i32
    return %c0_i32, %c0_i32_0 : i32, i32
  }
  func.func @transform_10(%arg0: i32) -> (i32, i32) {
    %c0_i32 = arith.constant 0 : i32
    %c0_i32_0 = arith.constant 0 : i32
    %c0_i32_1 = arith.constant 0 : i32
    return %c0_i32, %c0_i32_0 : i32, i32
  }
  func.func @transform_11(%arg0: i32) -> (i32, i32, i32) {
    %c0_i32 = arith.constant 0 : i32
    %c0_i32_0 = arith.constant 0 : i32
    %c0_i32_1 = arith.constant 0 : i32
    return %arg0, %c0_i32, %c0_i32_0 : i32, i32, i32
  }
  func.func @transform_12(%arg0: i32) -> (i32, i32, i32, i32) {
    %c0_i32 = arith.constant 0 : i32
    %c0_i32_0 = arith.constant 0 : i32
    %c0_i32_1 = arith.constant 0 : i32
    %c0_i32_2 = arith.constant 0 : i32
    return %arg0, %c0_i32, %c0_i32_0, %c0_i32_1 : i32, i32, i32, i32
  }
}

</mosaic_0001>

<bundles_post_ra>
// kernel: tpu_custom_call.1
= control target key start
LH: loop header
LB: loop body
LE: loop exit
PB: predicated region body
PF: predicated region fallthrough
CT: control target
= control target key end

     0   :  { %s2177_s0 = inlined_call_operand.hbm [shape: f32[2,8,32], index: 0, kind: input, shape index: {}]   ;;  %s2178_s1 = inlined_call_operand.vmem [shape: f32[32,96], index: 1, kind: input, shape index: {}]   ;;  %s2179_s2 = inlined_call_operand.vmem [shape: f32[2,16,32], index: 2, kind: input, shape index: {}]   ;;  %s2180_s3 = inlined_call_operand.vmem [shape: f32[1,32], index: 3, kind: input, shape index: {}]   ;;  %s2181_s4 = inlined_call_operand.vmem [shape: f32[1,32], index: 4, kind: input, shape index: {}]   ;;  %s2182_s5 = inlined_call_operand.vmem [shape: f32[32,64], index: 5, kind: input, shape index: {}]   ;;  %s2183_s6 = inlined_call_operand.vmem [shape: f32[1,64], index: 6, kind: input, shape index: {}]   ;;  %s2184_s7 = inlined_call_operand.vmem [shape: f32[64,32], index: 7, kind: input, shape index: {}]   ;;  %s2185_s8 = inlined_call_operand.vmem [shape: f32[1,32], index: 8, kind: input, shape index: {}]   ;;  %s2186_s9 = inlined_call_operand.vmem [shape: f32[1,32], index: 9, kind: input, shape index: {}]   ;;  %s2187_s10 = inlined_call_operand.vmem [shape: f32[1,32], index: 10, kind: input, shape index: {}]   ;;  %s2188_s11 = inlined_call_operand.hbm [shape: f32[2,8,32], index: 11, kind: output, shape index: {0}]   ;;  %s2189_s12 = inlined_call_operand.hbm [shape: f32[2,2,8,8], index: 12, kind: output, shape index: {1}]  }
   0x1   :  { %2195 = sst [smem:[#allocation14_spill]] %s2177_s0 }
   0x2   :  { %18 = vsyncpa [#allocation3], 0 }
   0x3   :  { %20 = vsyncpa [#allocation3 + $0x1], 0 }
   0x4   :  { %21 = vsyncpa [#allocation4], 0 }
   0x5   :  { %23 = vsyncpa [#allocation4 + $0x1], 0 }
   0x6   :  { %24 = vsyncpa [#allocation7], 0 }
   0x7   :  { %26 = vsyncpa [#allocation7 + $0x1], 0  ;;  %s1839_s21 = smov 0   ;;  %s1841_s22 = smov 0  }
   0x8   :  { %s1843_s23 = smov 0   ;;  %s1845_s24 = smov 0  }
   0x9 LB: > { %2196 = sst [smem:[#allocation11_spill]] %s1755_s23  ;;  %s1860_s25 = sadd.s32 4294967295, %s1759_s24   ;;  %s1759_s24 = sphi %s1845_s24, %s2211_s24   ;;  %s1755_s23 = sphi %s1843_s23, %s2213_s23   ;;  %s1751_s22 = sphi %s1841_s22, %s2215_s22   ;;  %s1747_s21 = sphi %s1839_s21, %s2214_s21  }
   0xa   : > { %s1383_s26 = sadd.s32 4294967294, %s1759_s24   ;;  %s1864_s27 = sadd.s32 1, %s1759_s24  }
   0xb   : > { %2197 = sst [smem:[#allocation12_spill]] %s1864_s27  ;;  %s39_s28 = sadd.s32 1, %s1755_s23 }
   0xc   : > { %s36_s29 = ssub.s32 %s1759_s24, %s1864_s27  ;;  %p46_p0 = scmp.ne.s32.totalorder %s1755_s23, %s1751_s22 }
   0xd   : > { %p37_p1 = scmp.eq.s32.totalorder %s36_s29, 0  ;;  %p47_p2 = scmp.eq.s32.totalorder %s1759_s24, 0 }
   0xe   : > { %p52_p3 = scmp.ne.s32.totalorder %s1751_s22, %s1747_s21  ;;  %p53_p4 = scmp.eq.s32.totalorder %s1860_s25, 0 }
   0xf   : > { %s1876_s30 = scalar_select %p37_p1, %s1755_s23, %s39_s28  }
  0x10   : > { %p1878_p5 = por %p47_p2, %p46_p0  ;;  %p1882_p6 = por %p53_p4, %p52_p3 }
  0x11   : > { %2198 = sst [smem:[#allocation13_spill]] %s1876_s30  ;;  %p286_p7 = scmp.eq.s32.totalorder %s1860_s25, 1 }
  0x12   : > { %p292_p8 = scmp.eq.s32.totalorder %s1383_s26, 1  ;;  %p1575_p10 = scmp.lt.s32.totalorder %s1759_s24, 2 }
  0x13   : > { %p1889_p11 = por %p286_p7, %p46_p0  ;;  %s368_s17 = sand.u32 1, %s1755_s23  }
  0x14   : > { %p1893_p12 = por %p292_p8, %p52_p3  ;;  %s1387_s18 = sshll.u32 %s1759_s24, 7 }
  0x15   : > { %s2201_s15 = scalar_select %p1889_p11, 1, 0 }
  0x16   : > { %s2202_s16 = scalar_select %p1893_p12, 1, 0 }
  0x17   : > { %s1386_s19 = sshll.u32 %s368_s17, 3  ;;  %s2203_s0 = sld [smem:[#allocation14_spill]] }
  0x18   : > { %s372_s26 = scalar_lea.vmem [#allocation2], %s1386_s19  ;;  %p1906_p13 = pnand %p1575_p10, %p1878_p5 }
  0x19   : > { %s379_s30 = sshll.u32 %s372_s26, 4  ;;  %s369_s20 = scalar_lea.sflag [#allocation3], %s368_s17  ;;  %s1910_s30 = int_to_ptr.vmem [resolvable:$true] %s379_s30 }
  0x1a   : > { %p1633_p3 = pneg %p1906_p13 }
  0x1d   : > { %s1902_s29 = scalar_lea.hbm %s2203_s0, %s1387_s18  ;;  %s1636_s28 = scalar_lea.hbm %s2203_s0, 256 }
  0x1e   : > { %s1631_s18 = scalar_lea.hbm %s1902_s29, 128  ;;  %p1637_p5 = scmp.lt.u32.totalorder %s1902_s29, %s2203_s0 }
  0x1f   : > { %p1632_p2 = scmp.ne.s32.totalorder %s1902_s29, %s1631_s18  ;;  %p1638_p8 = scmp.lt.u32.totalorder %s1636_s28, %s1631_s18 }
  0x20   : > { %p1640_p9 = scmp.lt.u32.totalorder %s1631_s18, %s1902_s29 }
  0x21   : > { %p1634_p4 = pnand %p1633_p3, %p1632_p2  ;;  %p1639_p10 = por %p1638_p8, %p1637_p5 }
  0x23   : > { %p1635_p7 = pneg %p1634_p4  ;;  %p1641_p0 = por %p1640_p9, %p1639_p10 }
  0x25   : > { %p1642_p1 = pnand %p1641_p0, %p1635_p7 }
  0x27   : > { %1645 = shalt.err (!%p1642_p1)
}
  0x28   : > { %s1646_s17 = scalar_lea.vmem %s1910_s30, 128  ;;  %s1761_s13 = smov [#allocation2]  }
  0x29   : > { %p1647_p2 = scmp.ne.s32.totalorder %s1910_s30, %s1646_s17  ;;  %s1651_s19 = sshll.u32 %s1761_s13, 4  ;;  %s1652_s19 = int_to_ptr.vmem [resolvable:$false] %s1651_s19 }
  0x2a   : > { %s1653_s23 = scalar_lea.vmem %s1652_s19, 256  ;;  %p1654_p11 = scmp.lt.s32.totalorder %s1910_s30, %s1652_s19 }
  0x2b   : > { %p1649_p4 = pnand %p1647_p2, %p1633_p3  ;;  %p1655_p5 = scmp.lt.s32.totalorder %s1653_s23, %s1646_s17 }
  0x2d   : > { %p1650_p12 = pneg %p1649_p4  ;;  %p1656_p8 = por %p1655_p5, %p1654_p11 }
  0x2f   : > { %p1657_p9 = pnand %p1656_p8, %p1650_p12 }
  0x31   : > { %1660 = shalt.err (!%p1657_p9)
}
  0x32   : > { %1567 = dma.hbm_to_vmem [thread:$0]  (!%p1906_p13), %s1902_s29, 128, %s1910_s30, %s369_s20  }
  0x33   : > { %p2205_p0 = scmp.lt.s32.totalorder %s1759_s24, 3  ;;  %p2206_p1 = scmp.ge.s32.totalorder %s1759_s24, 1 }
  0x35   : > { %p385_p3 = pnand %p2206_p1, %p2205_p0 }
  0x36   : > { %s1944_s18 = sand.u32 (!%p385_p3), 1, %s1751_s22  }
  0x37   : > { %388 = sbr.rel (%p385_p3) target bundleno = 2279 (0x8e7), region = 64  ;;  %s2194_s28 = sshll.u32 (!%p385_p3), %s1944_s18, 3 }
  0x38   : > { %s391_s26 = scalar_lea.sflag (!%p385_p3), [#allocation3], %s1944_s18  ;;  %s394_s27 = scalar_lea.vmem (!%p385_p3), [#allocation2], %s2194_s28 }
  0x3e   : > { %1734 = dma.done.wait (%p1882_p6), %s391_s26, 128  }
  0x3f   : > { %1736 = vsyncadd (%p1882_p6), %s391_s26, 4294967168  ;;  %v1762_v0 = vmov 0.0|0.0   ;;  %vm1763_vm0 = vmmov 0   ;;  %v1764_v1 = vmov 0.0   ;;  %v441_v2 = vld [vmem:[%s2178_s1] sm:$0xff]  ;;  %v442_v3 = vld [vmem:[%s2178_s1 + $0x8] sm:$0xff] }
  0x40   : > { %1528 = vmatprep.subr.bf16.mxu0 %v1762_v0  ;;  %1461 = vmatprep.mubr.msk.f32.mxu0 %vm1763_vm0, %v1764_v1  ;;  %v443_v4 = vld [vmem:[%s2178_s1 + $0x10] sm:$0xff]  ;;  %v1529_v5 = vpack.c.bf16 %v442_v3, %v441_v2  ;;  %v444_v6 = vld [vmem:[%s2178_s1 + $0x18] sm:$0xff]  ;;  %v1973_v8 = vld [vmem:[%s394_s27] sm:$0xff]  ;;  %vm445_vm1 = vcmask 261120   ;;  %s1765_s26 = smov 112   ;;  %s1766_s30 = smov 96  }
  0x41   : > { %1469 = vmatprep.subr.mxu1 %v1764_v1  ;;  %1471 = vmatprep.mubr.msk.f32.mxu1 %vm1763_vm0, %v1764_v1  ;;  %v1532_v7 = vpack.c.bf16 %v444_v6, %v443_v4  ;;  %s1767_s29 = smov 80   ;;  %vm522_vm2 = vcmask 130048   ;;  %vm597_vm3 = vcmask 64512   ;;  %s1768_s27 = smov 48   ;;  %v689_v32 = vld [vmem:[%s2179_s2] sm:$0xff]  ;;  %v690_v33 = vld [vmem:[%s2179_s2 + $0x8] sm:$0xff] }
  0x42   : > { %1530 = vmatpush3.bf16.msra.mxu0 %v1529_v5  ;;  %s1769_s20 = smov 64   ;;  %v1538_v34 = vpack.c.bf16 %v690_v33, %v689_v32  ;;  %v1400_v35 = vld [vmem:[%s2179_s2 + $0x10] sm:$0xff]  ;;  %v1401_v36 = vld [vmem:[%s2179_s2 + $0x18] sm:$0xff]  ;;  %v1041_v62 = vld [vmem:[%s2182_s5] sm:$0xff]  ;;  %vm1141_vm4 = vcmask 523264   ;;  %s1419_s13 = sshll.u32 %s1860_s25, 8 }
  0x43   : > { %1531 = vmatprep.subr.bf16.mxu0 %v1762_v0  ;;  %v1535_v37 = vpack.c.bf16 %v1401_v36, %v1400_v35  ;;  %v1042_v63 = vld [vmem:[%s2182_s5 + $0x8] sm:$0xff]  ;;  %v1043_v2 = vld [vmem:[%s2182_s5 + $0x10] sm:$0xff]  ;;  %v1044_v3 = vld [vmem:[%s2182_s5 + $0x18] sm:$0xff]  ;;  %p2207_p11 = scmp.ne.s32.totalorder %s2201_s15, 0  ;;  %s1770_s14 = smov [#allocation6]  }
  0x44   : > { %v1544_v4 = vpack.c.bf16 %v1044_v3, %v1043_v2  ;;  %v1126_v5 = vld [vmem:[%s2184_s7] sm:$0xff]  ;;  %v1127_v6 = vld [vmem:[%s2184_s7 + $0x8] sm:$0xff]  ;;  %s1665_s28 = sshll.u32 %s1770_s14, 4  ;;  %s1666_s28 = int_to_ptr.vmem [resolvable:$false] %s1665_s28 }
  0x46   : > { %1533 = vmatpush3.bf16.msra.mxu0 %v1532_v7  ;;  %v1128_v7 = vld [vmem:[%s2184_s7 + $0x10] sm:$0xff] }
  0x47   : > { %1464 = vmatprep.subr.mxu0 %v1764_v1 }
  0x49   : > { %1462 = vmatmul.mubr.msk.f32.vlgmr.msra.gmra.mrb[0].mxu0 %vm445_vm1, %v1973_v8 }
  0x4a   : > { %1466 = vmatprep.mubr.msk.f32.mxu0 %vm1763_vm0, %v1764_v1 }
 0x11c   : > { %v515_v9 = vpop.f32.mrb[0].mxu0 }
 0x11d   : > { %691 = vrot.lane.b32.xlu1 %v515_v9, %s1765_s26  ;;  %520 = vrot.lane.b32.xlu0 %v515_v9, %s1766_s30  ;;  %v1463_v10 = vpop.f32.mrb[1].mxu0  ;;  %s2092_s30 = scalar_lea.hbm %s2189_s12, %s1419_s13 }
 0x121   : > { %693 = vrot.lane.b32.xlu0 %v515_v9, %s1767_s29  ;;  %s1252_s29 = scalar_lea.sflag [#allocation7], %s1944_s18 }
 0x18f   : > { %v521_v11 = vpop.permute.xlu0 %520  ;;  %v692_v13 = vpop.permute.xlu1 %691 }
 0x190   : > { %1465 = vmatpush3.xpose.msk.msra.mxu0 %vm522_vm2, %v521_v11  ;;  %v1130_v11 = vld [vmem:[%s2184_s7 + $0x20] sm:$0xff] }
 0x191   : > { %1474 = vmatprep.subr.mxu0 %v1764_v1 }
 0x193   : > { %1467 = vmatmul.mubr.msk.f32.vlgmr.msra.gmra.mrb[2].mxu0 %vm522_vm2, %v515_v9  ;;  %v694_v12 = vpop.permute.xlu0 %693 }
 0x194   : > { %1475 = vmatpush3.xpose.msk.msra.mxu0 %vm522_vm2, %v694_v12  ;;  %1476 = vmatprep.mubr.msk.f32.mxu0 %vm1763_vm0, %v1764_v1  ;;  %v1131_v12 = vld [vmem:[%s2184_s7 + $0x28] sm:$0xff] }
 0x195   : > { %1534 = vmatprep.subr.bf16.mxu0 %v1762_v0 }
 0x197   : > { %1477 = vmatmul.mubr.msk.f32.vlgmr.msra.gmra.mrb[4].mxu0 %vm522_vm2, %v692_v13  ;;  %v1553_v13 = vpack.c.bf16 %v1131_v12, %v1130_v11 }
 0x198   : > { %1488 = vmatprep.mubr.msk.f32.mxu0 %vm1763_vm0, %v1764_v1  ;;  %1536 = vmatpush3.bf16.msra.mxu0 %v1535_v37 }
 0x199   : > { %1540 = vmatprep.subr.bf16.mxu0 %v1762_v0 }
 0x266   : > { %v593_v14 = vpop.f32.mrb[2].mxu0 }
 0x267   : > { %v1468_v15 = vpop.f32.mrb[3].mxu0  ;;  %v598_v16 = vsel %vm597_vm3, %v593_v14, -inf }
 0x268   : > { %599 = vmax.xlane.f32.xlu1 %v598_v16 }
 0x26a   : > { %v765_v17 = vpop.f32.mrb[4].mxu0 }
 0x26b   : > { %v1478_v18 = vpop.f32.mrb[5].mxu0  ;;  %v769_v19 = vsel %vm597_vm3, %v765_v17, -inf }
 0x26c   : > { %770 = vmax.xlane.f32.xlu0 %v769_v19  ;;  %v1404_v18 = vld [vmem:[%s2180_s3] ss:$0 sm:$0xff] }
 0x279   : > { %783 = vrot.lane.b32.xlu1 %v515_v9, %s1768_s27  ;;  %s1391_s27 = sshll.u32 %s1944_s18, 4 }
 0x282   : > { %611 = vrot.lane.b32.xlu0 %v515_v9, %s1769_s20  ;;  %s2017_s20 = scalar_lea.vmem [#allocation6], %s1391_s27  ;;  %v1129_v9 = vld [vmem:[%s2184_s7 + $0x18] sm:$0xff] }
 0x283   : > { %v1550_v10 = vpack.c.bf16 %v1129_v9, %v1128_v7  ;;  %s1278_s19 = sshll.u32 %s2017_s20, 4  ;;  %s2094_s19 = int_to_ptr.vmem [resolvable:$true] %s1278_s19 }
 0x284   : > { %s1661_s27 = scalar_lea.vmem %s2094_s19, 256  ;;  %p1668_p7 = scmp.lt.s32.totalorder %s2094_s19, %s1666_s28 }
 0x285   : > { %p1662_p6 = scmp.ne.s32.totalorder %s2094_s19, %s1661_s27 }
 0x287   : > { %p1663_p12 = pnand %p1662_p6, %p2207_p11 }
 0x289   : > { %p1664_p13 = pneg %p1663_p12 }
 0x2f5   : > { %v600_v20 = vpop.xlane.xlu1 %599 }
 0x2f6   : > { %v601_v21 = vsub.f32 %v593_v14, %v600_v20  ;;  %v1405_v20 = vld [vmem:[%s2181_s4] ss:$0 sm:$0xff] }
 0x2f8   : > { %v602_v22 = vmul.f32 1.442695, %v601_v21 }
 0x2f9   : > { %v771_v23 = vpop.xlane.xlu0 %770  ;;  %v784_v28 = vpop.permute.xlu1 %783 }
 0x2fa   : > { %1619 = vpow2.f32 %v602_v22  ;;  %v772_v24 = vsub.f32 %v765_v17, %v771_v23  ;;  %v1133_v23 = vld [vmem:[%s2184_s7 + $0x38] sm:$0xff] }
 0x2fc   : > { %v773_v25 = vmul.f32 1.442695, %v772_v24 }
 0x2fd   : > { %v612_v26 = vpop.permute.xlu0 %611 }
 0x2fe   : > { %1621 = vpow2.f32 %v773_v25  ;;  %1470 = vmatpush3.msra.mxu1 %v612_v26  ;;  %v1406_v25 = vld [vmem:[%s2183_s6] ss:$0 sm:$0xff] }
 0x2ff   : > { %1479 = vmatprep.subr.mxu1 %v1764_v1 }
 0x304   : > { %v1620_v27 = vpop.eup %1619 }
 0x305   : > { %1472 = vmatmul.mubr.msk.f32.vlgmr.msra.gmra.mrb[0].mxu1 %vm597_vm3, %v1620_v27  ;;  %v604_v29 = vsel %vm597_vm3, %v1620_v27, 0.0 }
 0x306   : > { %1480 = vmatpush3.msra.mxu1 %v784_v28  ;;  %605 = vadd.xlane.f32.xlu1 %v604_v29 }
 0x307   : > { %1481 = vmatprep.mubr.msk.f32.mxu1 %vm1763_vm0, %v1764_v1  ;;  %1537 = vmatprep.subr.bf16.mxu1 %v1762_v0 }
 0x308   : > { %v1622_v30 = vpop.eup %1621 }
 0x309   : > { %1482 = vmatmul.mubr.msk.f32.vlgmr.msra.gmra.mrb[2].mxu1 %vm597_vm3, %v1622_v30  ;;  %v775_v31 = vsel %vm597_vm3, %v1622_v30, 0.0 }
 0x30a   : > { %776 = vadd.xlane.f32.xlu0 %v775_v31  ;;  %1495 = vmatprep.mubr.msk.f32.mxu1 %vm1763_vm0, %v1764_v1 }
 0x30b   : > { %1539 = vmatpush3.bf16.msra.mxu1 %v1538_v34 }
 0x30c   : > { %1546 = vmatprep.subr.bf16.mxu1 %v1762_v0 }
 0x393   : > { %v606_v38 = vpop.xlane.xlu1 %605 }
 0x394   : > { %1623 = vrcp.f32 %v606_v38 }
 0x397   : > { %v777_v39 = vpop.xlane.xlu0 %776 }
 0x398   : > { %1625 = vrcp.f32 %v777_v39 }
 0x39e   : > { %v1624_v40 = vpop.eup %1623 }
 0x39f   : > { %v609_v41 = vmul.f32 %v1624_v40, %v1620_v27 }
 0x3a1   : > { %610 = vst.msk [vmem:[%s2017_s20] sm:$0xff] %vm597_vm3, %v609_v41 }
 0x3a2   : > { %v1626_v42 = vpop.eup %1625 }
 0x3a3   : > { %v780_v43 = vmul.f32 %v1626_v42, %v1622_v30  ;;  %v1408_v30 = vld [vmem:[%s2185_s8] ss:$0 sm:$0xff] }
 0x3a5   : > { %1398 = vst.msk [vmem:[%s2017_s20 + $0x8] sm:$0xff] %vm597_vm3, %v780_v43  ;;  %s1667_s20 = scalar_lea.vmem %s1666_s28, 512 }
 0x3a6   : > { %p1669_p10 = scmp.lt.s32.totalorder %s1667_s20, %s1661_s27 }
 0x3a8   : > { %p1670_p2 = por %p1669_p10, %p1668_p7 }
 0x3aa   : > { %p1671_p4 = pnand %p1670_p2, %p1664_p13 }
 0x3d8   : > { %v683_v44 = vpop.f32.mrb[0].mxu1 }
 0x3d9   : > { %v688_v45 = vmul.f32 %v1624_v40, %v683_v44  ;;  %v1473_v46 = vpop.f32.mrb[1].mxu1 }
 0x3db   : > { %1496 = vmatmul.mubr.msk.f32.vlgmr.msra.gmra.mrb[4].mxu1 %vm522_vm2, %v688_v45 }
 0x3dc   : > { %v855_v47 = vpop.f32.mrb[2].mxu1  ;;  %1525 = vmatprep.mubr.msk.f32.mxu1 %vm1763_vm0, %v1764_v1 }
 0x3dd   : > { %v860_v48 = vmul.f32 %v1626_v42, %v855_v47  ;;  %v1483_v49 = vpop.f32.mrb[3].mxu1 }
 0x3df   : > { %1489 = vmatmul.mubr.msk.f32.vlgmr.msra.gmra.mrb[6].mxu0 %vm522_vm2, %v860_v48 }
 0x3e0   : > { %1506 = vmatprep.mubr.msk.f32.mxu0 %vm1763_vm0, %v1764_v1  ;;  %v1541_v1 = vpack.c.bf16 %v1042_v63, %v1041_v62 }
 0x3e2   : > { %1542 = vmatpush3.bf16.msra.mxu0 %v1541_v1 }
 0x3e3   : > { %1543 = vmatprep.subr.bf16.mxu0 %v1762_v0 }
 0x3e6   : > { %1545 = vmatpush3.bf16.msra.mxu0 %v1544_v4 }
 0x4ae   : > { %v1006_v50 = vpop.f32.mrb[4].mxu1 }
 0x4af   : > { %v1497_v51 = vpop.f32.mrb[5].mxu1 }
 0x4b2   : > { %v933_v52 = vpop.f32.mrb[6].mxu0 }
 0x4b3   : > { %v1007_v53 = vadd.f32 %v1006_v50, %v933_v52  ;;  %v1490_v54 = vpop.f32.mrb[7].mxu0 }
 0x4b5   : > { %v1010_v55 = vadd.f32 %v1007_v53, %v1973_v8  ;;  %v1547_v8 = vpack.c.bf16 %v1127_v6, %v1126_v5 }
 0x4b7   : > { %v1011_v56 = vsel %vm445_vm1, %v1010_v55, 0.0  ;;  %1548 = vmatpush3.bf16.msra.mxu1 %v1547_v8 }
 0x4b8   : > { %1012 = vadd.xlane.f32.xlu0 %v1011_v56  ;;  %1549 = vmatprep.subr.bf16.mxu1 %v1762_v0 }
 0x4bb   : > { %1551 = vmatpush3.bf16.msra.mxu1 %v1550_v10 }
 0x4bc   : > { %1552 = vmatprep.subr.bf16.mxu1 %v1762_v0 }
 0x4bf   : > { %1554 = vmatpush3.bf16.msra.mxu1 %v1553_v13 }
 0x4c0   : > { %1555 = vmatprep.subr.bf16.mxu1 %v1762_v0  ;;  %v1132_v0 = vld [vmem:[%s2184_s7 + $0x30] sm:$0xff] }
 0x4c1   : > { %v1556_v24 = vpack.c.bf16 %v1133_v23, %v1132_v0 }
 0x4c3   : > { %1557 = vmatpush3.bf16.msra.mxu1 %v1556_v24 }
 0x545   : > { %v1013_v57 = vpop.xlane.xlu0 %1012 }
 0x546   : > { %v1015_v58 = vmul.f32 0.03125, %v1013_v57 }
 0x548   : > { %v1016_v59 = vsub.f32 %v1010_v55, %v1015_v58 }
 0x54a   : > { %v1017_v60 = vmul.f32 %v1016_v59, %v1016_v59 }
 0x54c   : > { %v1018_v61 = vsel %vm445_vm1, %v1017_v60, 0.0 }
 0x54d   : > { %1019 = vadd.xlane.f32.xlu1 %v1018_v61 }
 0x5da   : > { %v1020_v14 = vpop.xlane.xlu1 %1019 }
 0x5db   : > { %v1021_v15 = vmul.f32 0.03125, %v1020_v14 }
 0x5dd   : > { %v1022_v16 = vadd.f32 1e-06, %v1021_v15 }
 0x5df   : > { %1627 = vrsqrt.f32 %v1022_v16 }
 0x5e9   : > { %v1628_v17 = vpop.eup %1627 }
 0x5ea   : > { %v1024_v19 = vmul.f32 %v1628_v17, %v1016_v59 }
 0x5ec   : > { %v1032_v21 = vmul.f32 %v1404_v18, %v1024_v19 }
 0x5ee   : > { %v1040_v22 = vadd.f32 %v1405_v20, %v1032_v21 }
 0x5f0   : > { %1507 = vmatmul.mubr.msk.f32.vlgmr.msra.gmra.mrb[8].mxu0 %vm445_vm1, %v1040_v22 }
 0x6c3   : > { %v1121_v26 = vpop.f32.mrb[8].mxu0 }
 0x6c4   : > { %v1122_v27 = vadd.f32 %v1406_v25, %v1121_v26  ;;  %v1508_v28 = vpop.f32.mrb[9].mxu0 }
 0x6c6   : > { %v1125_v29 = vmax.f32 %v1122_v27, 0.0 }
 0x6c8   : > { %1526 = vmatmul.mubr.msk.f32.vlgmr.msra.gmra.mrb[6].mxu1 %vm1141_vm4, %v1125_v29 }
 0x79b   : > { %v1211_v31 = vpop.f32.mrb[6].mxu1 }
 0x79c   : > { %v1212_v32 = vadd.f32 %v1408_v30, %v1211_v31  ;;  %v1527_v33 = vpop.f32.mrb[7].mxu1 }
 0x79e   : > { %v1215_v34 = vadd.f32 %v1212_v32, %v1040_v22 }
 0x7a0   : > { %v1216_v35 = vsel %vm445_vm1, %v1215_v34, 0.0 }
 0x7a1   : > { %1217 = vadd.xlane.f32.xlu0 %v1216_v35 }
 0x82e   : > { %v1218_v36 = vpop.xlane.xlu0 %1217 }
 0x82f   : > { %v1219_v37 = vmul.f32 0.03125, %v1218_v36 }
 0x831   : > { %v1220_v38 = vsub.f32 %v1215_v34, %v1219_v37 }
 0x833   : > { %v1221_v39 = vmul.f32 %v1220_v38, %v1220_v38 }
 0x835   : > { %v1222_v40 = vsel %vm445_vm1, %v1221_v39, 0.0 }
 0x836   : > { %1223 = vadd.xlane.f32.xlu1 %v1222_v40 }
 0x837   : > { %1674 = shalt.err (!%p1671_p4)
}
 0x838   : > { %s1675_s17 = scalar_lea.hbm %s2092_s30, 256  ;;  %s1679_s26 = scalar_lea.hbm %s2189_s12, 512 }
 0x839   : > { %p1676_p5 = scmp.ne.s32.totalorder %s2092_s30, %s1675_s17  ;;  %p1680_p0 = scmp.lt.u32.totalorder %s2092_s30, %s2189_s12 }
 0x83a   : > { %p1681_p1 = scmp.lt.u32.totalorder %s1679_s26, %s1675_s17  ;;  %p1683_p6 = scmp.lt.u32.totalorder %s1675_s17, %s2092_s30 }
 0x83b   : > { %p1677_p8 = pnand %p1676_p5, %p2207_p11 }
 0x83c   : > { %p1682_p3 = por %p1681_p1, %p1680_p0 }
 0x83d   : > { %p1678_p9 = pneg %p1677_p8 }
 0x83e   : > { %p1684_p12 = por %p1683_p6, %p1682_p3 }
 0x840   : > { %p1685_p13 = pnand %p1684_p12, %p1678_p9 }
 0x842   : > { %1688 = shalt.err (!%p1685_p13)
}
 0x843   : > { %s1771_s27 = smov 128   ;;  %s1772_s20 = smov 8   ;;  %v1410_v45 = vld [vmem:[%s2186_s9] ss:$0 sm:$0xff] }
 0x844   : > { %1561 = dma.vmem_to_hbm [thread:$0]  (%p2207_p11), %s2094_s19, 256, %s2092_s30, %s1252_s29, %s1771_s27, %s1771_s27, %s1772_s20  }
 0x845   : > { %v1411_v47 = vld [vmem:[%s2187_s10] ss:$0 sm:$0xff]  ;;  %s1414_s14 = sshll.u32 %s1860_s25, 7  ;;  %s2208_s28 = sshll.u32 %s1944_s18, 3 }
 0x846   : > { %s432_s0 = scalar_lea.vmem [#allocation5], %s2208_s28  ;;  %s2132_s27 = scalar_lea.hbm %s2188_s11, %s1414_s14 }
 0x847   : > { %s1265_s19 = sshll.u32 %s432_s0, 4  ;;  %s1247_s20 = scalar_lea.sflag [#allocation4], %s1944_s18  ;;  %s2134_s19 = int_to_ptr.vmem [resolvable:$true] %s1265_s19 }
 0x848   : > { %s1689_s17 = scalar_lea.vmem %s2134_s19, 128  ;;  %s1773_s25 = smov [#allocation5]  }
 0x849   : > { %p1690_p7 = scmp.ne.s32.totalorder %s2134_s19, %s1689_s17  ;;  %s1693_s13 = sshll.u32 %s1773_s25, 4  ;;  %s1694_s13 = int_to_ptr.vmem [resolvable:$false] %s1693_s13 }
 0x84a   : > { %s1695_s23 = scalar_lea.vmem %s1694_s13, 256  ;;  %p1696_p4 = scmp.lt.s32.totalorder %s2134_s19, %s1694_s13 }
 0x84b   : > { %p1691_p10 = pnand %p1690_p7, %p2207_p11  ;;  %p1697_p5 = scmp.lt.s32.totalorder %s1695_s23, %s1689_s17 }
 0x84d   : > { %p1692_p2 = pneg %p1691_p10  ;;  %p1698_p8 = por %p1697_p5, %p1696_p4 }
 0x84f   : > { %p1699_p9 = pnand %p1698_p8, %p1692_p2 }
 0x8c3   : > { %v1224_v41 = vpop.xlane.xlu1 %1223 }
 0x8c4   : > { %v1225_v42 = vmul.f32 0.03125, %v1224_v41 }
 0x8c6   : > { %v1226_v43 = vadd.f32 1e-06, %v1225_v42 }
 0x8c8   : > { %1629 = vrsqrt.f32 %v1226_v43 }
 0x8d2   : > { %v1630_v44 = vpop.eup %1629 }
 0x8d3   : > { %v1228_v46 = vmul.f32 %v1630_v44, %v1220_v38 }
 0x8d5   : > { %v1236_v48 = vmul.f32 %v1410_v45, %v1228_v46 }
 0x8d7   : > { %v1244_v49 = vadd.f32 %v1411_v47, %v1236_v48 }
 0x8d9   : > { %1245 = vst.msk [vmem:[%s432_s0] sm:$0xff] %vm445_vm1, %v1244_v49 }
 0x8da   : > { %1702 = shalt.err (!%p1699_p9)
}
 0x8db   : > { %s1703_s0 = scalar_lea.hbm %s2132_s27, 128  ;;  %s1707_s14 = scalar_lea.hbm %s2188_s11, 256 }
 0x8dc   : > { %p1704_p0 = scmp.ne.s32.totalorder %s2132_s27, %s1703_s0  ;;  %p1708_p6 = scmp.lt.u32.totalorder %s2132_s27, %s2188_s11 }
 0x8dd   : > { %p1709_p12 = scmp.lt.u32.totalorder %s1707_s14, %s1703_s0  ;;  %p1711_p7 = scmp.lt.u32.totalorder %s1703_s0, %s2132_s27 }
 0x8de   : > { %p1705_p1 = pnand %p1704_p0, %p2207_p11 }
 0x8df   : > { %p1710_p13 = por %p1709_p12, %p1708_p6 }
 0x8e0   : > { %p1706_p3 = pneg %p1705_p1 }
 0x8e1   : > { %p1712_p10 = por %p1711_p7, %p1710_p13 }
 0x8e3   : > { %p1713_p2 = pnand %p1712_p10, %p1706_p3 }
 0x8e5   : > { %1716 = shalt.err (!%p1713_p2)
}
 0x8e6   : > { %1560 = dma.vmem_to_hbm [thread:$0]  (%p2207_p11), %s2134_s19, 128, %s2132_s27, %s1247_s20  }
 0x8e7 PF: > { %s1293_s29 = sand.u32 1, %s1747_s21   ;;  %p2209_p4 = scmp.ne.s32.totalorder %s2202_s16, 0 }
 0x8e8   : > { %p2210_p5 = scmp.ge.s32.totalorder %s1759_s24, 2  ;;  %s1294_s17 = scalar_lea.sflag [#allocation4], %s1293_s29 }
 0x8ea   : > { %p1569_p8 = pnand %p2210_p5, %p2209_p4 }
 0x8ec   : > { %1738 = dma.done.wait (!%p1569_p8), %s1294_s17, 128  }
 0x8ed   : > { %1740 = vsyncadd (!%p1569_p8), %s1294_s17, 4294967168  ;;  %s1303_s25 = scalar_lea.sflag [#allocation7], %s1293_s29 }
 0x8ee   : > { %1742 = dma.done.wait (!%p1569_p8), %s1303_s25, 256  }
 0x8ef   : > { %1744 = vsyncadd (!%p1569_p8), %s1303_s25, 4294967040  ;;  %s2211_s24 = sld [smem:[#allocation12_spill]]  ;;  %s2212_s15 = sld [smem:[#allocation11_spill]] }
 0x8f0   : > { %s2213_s23 = sld [smem:[#allocation13_spill]]  ;;  %s2214_s21 = smov %s1751_s22 }
 0x8f5   : > { %p29_p11 = scmp.ge.s32.totalorder %s2211_s24, 4   ;;  %s2215_s22 = smov %s2212_s15 }
 0x8f7   :  { %31 = sbr.rel (!%p29_p11) target bundleno = 9 (0x9), region = 128 }
 0x8fe   :  { %1308 = vsyncpa [#allocation3], 1 }
 0x8ff   :  { %1310 = vsyncpa [#allocation3 + $0x1], 1 }
 0x900   :  { %1311 = vsyncpa [#allocation4], 1 }
 0x901   :  { %1313 = vsyncpa [#allocation4 + $0x1], 1 }
 0x902   :  { %1314 = vsyncpa [#allocation7], 1 }
 0x903   :  { %1316 = vsyncpa [#allocation7 + $0x1], 1 }

// kernel: tpu_custom_call.1
= control target key start
LH: loop header
LB: loop body
LE: loop exit
PB: predicated region body
PF: predicated region fallthrough
CT: control target
= control target key end

     0   :  { %s2177_s0 = inlined_call_operand.hbm [shape: f32[2,8,32], index: 0, kind: input, shape index: {}]   ;;  %s2178_s1 = inlined_call_operand.vmem [shape: f32[32,96], index: 1, kind: input, shape index: {}]   ;;  %s2179_s2 = inlined_call_operand.vmem [shape: f32[2,16,32], index: 2, kind: input, shape index: {}]   ;;  %s2180_s3 = inlined_call_operand.vmem [shape: f32[1,32], index: 3, kind: input, shape index: {}]   ;;  %s2181_s4 = inlined_call_operand.vmem [shape: f32[1,32], index: 4, kind: input, shape index: {}]   ;;  %s2182_s5 = inlined_call_operand.vmem [shape: f32[32,64], index: 5, kind: input, shape index: {}]   ;;  %s2183_s6 = inlined_call_operand.vmem [shape: f32[1,64], index: 6, kind: input, shape index: {}]   ;;  %s2184_s7 = inlined_call_operand.vmem [shape: f32[64,32], index: 7, kind: input, shape index: {}]   ;;  %s2185_s8 = inlined_call_operand.vmem [shape: f32[1,32], index: 8, kind: input, shape index: {}]   ;;  %s2186_s9 = inlined_call_operand.vmem [shape: f32[1,32], index: 9, kind: input, shape index: {}]   ;;  %s2187_s10 = inlined_call_operand.vmem [shape: f32[1,32], index: 10, kind: input, shape index: {}]   ;;  %s2188_s11 = inlined_call_operand.hbm [shape: f32[2,8,32], index: 11, kind: output, shape index: {0}]   ;;  %s2189_s12 = inlined_call_operand.hbm [shape: f32[2,2,8,8], index: 12, kind: output, shape index: {1}]  }
   0x1   :  { %2195 = sst [smem:[#allocation14_spill]] %s2177_s0 }
   0x2   :  { %18 = vsyncpa [#allocation3], 0 }
   0x3   :  { %20 = vsyncpa [#allocation3 + $0x1], 0 }
   0x4   :  { %21 = vsyncpa [#allocation4], 0 }
   0x5   :  { %23 = vsyncpa [#allocation4 + $0x1], 0 }
   0x6   :  { %24 = vsyncpa [#allocation7], 0 }
   0x7   :  { %26 = vsyncpa [#allocation7 + $0x1], 0  ;;  %s1839_s21 = smov 0   ;;  %s1841_s22 = smov 0  }
   0x8   :  { %s1843_s23 = smov 0   ;;  %s1845_s24 = smov 0  }
   0x9 LB: > { %2196 = sst [smem:[#allocation11_spill]] %s1755_s23  ;;  %s1860_s25 = sadd.s32 4294967295, %s1759_s24   ;;  %s1759_s24 = sphi %s1845_s24, %s2211_s24   ;;  %s1755_s23 = sphi %s1843_s23, %s2213_s23   ;;  %s1751_s22 = sphi %s1841_s22, %s2215_s22   ;;  %s1747_s21 = sphi %s1839_s21, %s2214_s21  }
   0xa   : > { %s1383_s26 = sadd.s32 4294967294, %s1759_s24   ;;  %s1864_s27 = sadd.s32 1, %s1759_s24  }
   0xb   : > { %2197 = sst [smem:[#allocation12_spill]] %s1864_s27  ;;  %s39_s28 = sadd.s32 1, %s1755_s23 }
   0xc   : > { %s36_s29 = ssub.s32 %s1759_s24, %s1864_s27  ;;  %p46_p0 = scmp.ne.s32.totalorder %s1755_s23, %s1751_s22 }
   0xd   : > { %p37_p1 = scmp.eq.s32.totalorder %s36_s29, 0  ;;  %p47_p2 = scmp.eq.s32.totalorder %s1759_s24, 0 }
   0xe   : > { %p52_p3 = scmp.ne.s32.totalorder %s1751_s22, %s1747_s21  ;;  %p53_p4 = scmp.eq.s32.totalorder %s1860_s25, 0 }
   0xf   : > { %s1876_s30 = scalar_select %p37_p1, %s1755_s23, %s39_s28  }
  0x10   : > { %p1878_p5 = por %p47_p2, %p46_p0  ;;  %p1882_p6 = por %p53_p4, %p52_p3 }
  0x11   : > { %2198 = sst [smem:[#allocation13_spill]] %s1876_s30  ;;  %p286_p7 = scmp.eq.s32.totalorder %s1860_s25, 1 }
  0x12   : > { %p292_p8 = scmp.eq.s32.totalorder %s1383_s26, 1  ;;  %p1575_p10 = scmp.lt.s32.totalorder %s1759_s24, 2 }
  0x13   : > { %p1889_p11 = por %p286_p7, %p46_p0  ;;  %s368_s17 = sand.u32 1, %s1755_s23  }
  0x14   : > { %p1893_p12 = por %p292_p8, %p52_p3  ;;  %s1387_s18 = sshll.u32 %s1759_s24, 7 }
  0x15   : > { %s2201_s15 = scalar_select %p1889_p11, 1, 0 }
  0x16   : > { %s2202_s16 = scalar_select %p1893_p12, 1, 0 }
  0x17   : > { %s1386_s19 = sshll.u32 %s368_s17, 3  ;;  %s2203_s0 = sld [smem:[#allocation14_spill]] }
  0x18   : > { %s372_s26 = scalar_lea.vmem [#allocation2], %s1386_s19  ;;  %p1906_p13 = pnand %p1575_p10, %p1878_p5 }
  0x19   : > { %s379_s30 = sshll.u32 %s372_s26, 4  ;;  %s369_s20 = scalar_lea.sflag [#allocation3], %s368_s17  ;;  %s1910_s30 = int_to_ptr.vmem [resolvable:$true] %s379_s30 }
  0x1a   : > { %p1633_p3 = pneg %p1906_p13 }
  0x1d   : > { %s1902_s29 = scalar_lea.hbm %s2203_s0, %s1387_s18  ;;  %s1636_s28 = scalar_lea.hbm %s2203_s0, 256 }
  0x1e   : > { %s1631_s18 = scalar_lea.hbm %s1902_s29, 128  ;;  %p1637_p5 = scmp.lt.u32.totalorder %s1902_s29, %s2203_s0 }
  0x1f   : > { %p1632_p2 = scmp.ne.s32.totalorder %s1902_s29, %s1631_s18  ;;  %p1638_p8 = scmp.lt.u32.totalorder %s1636_s28, %s1631_s18 }
  0x20   : > { %p1640_p9 = scmp.lt.u32.totalorder %s1631_s18, %s1902_s29 }
  0x21   : > { %p1634_p4 = pnand %p1633_p3, %p1632_p2  ;;  %p1639_p10 = por %p1638_p8, %p1637_p5 }
  0x23   : > { %p1635_p7 = pneg %p1634_p4  ;;  %p1641_p0 = por %p1640_p9, %p1639_p10 }
  0x25   : > { %p1642_p1 = pnand %p1641_p0, %p1635_p7 }
  0x27   : > { %1645 = shalt.err (!%p1642_p1)
}
  0x28   : > { %s1646_s17 = scalar_lea.vmem %s1910_s30, 128  ;;  %s1761_s13 = smov [#allocation2]  }
  0x29   : > { %p1647_p2 = scmp.ne.s32.totalorder %s1910_s30, %s1646_s17  ;;  %s1651_s19 = sshll.u32 %s1761_s13, 4  ;;  %s1652_s19 = int_to_ptr.vmem [resolvable:$false] %s1651_s19 }
  0x2a   : > { %s1653_s23 = scalar_lea.vmem %s1652_s19, 256  ;;  %p1654_p11 = scmp.lt.s32.totalorder %s1910_s30, %s1652_s19 }
  0x2b   : > { %p1649_p4 = pnand %p1647_p2, %p1633_p3  ;;  %p1655_p5 = scmp.lt.s32.totalorder %s1653_s23, %s1646_s17 }
  0x2d   : > { %p1650_p12 = pneg %p1649_p4  ;;  %p1656_p8 = por %p1655_p5, %p1654_p11 }
  0x2f   : > { %p1657_p9 = pnand %p1656_p8, %p1650_p12 }
  0x31   : > { %1660 = shalt.err (!%p1657_p9)
}
  0x32   : > { %1567 = dma.hbm_to_vmem [thread:$0]  (!%p1906_p13), %s1902_s29, 128, %s1910_s30, %s369_s20  }
  0x33   : > { %p2205_p0 = scmp.lt.s32.totalorder %s1759_s24, 3  ;;  %p2206_p1 = scmp.ge.s32.totalorder %s1759_s24, 1 }
  0x35   : > { %p385_p3 = pnand %p2206_p1, %p2205_p0 }
  0x36   : > { %s1944_s18 = sand.u32 (!%p385_p3), 1, %s1751_s22  }
  0x37   : > { %388 = sbr.rel (%p385_p3) target bundleno = 2279 (0x8e7), region = 64  ;;  %s2194_s28 = sshll.u32 (!%p385_p3), %s1944_s18, 3 }
  0x38   : > { %s391_s26 = scalar_lea.sflag (!%p385_p3), [#allocation3], %s1944_s18  ;;  %s394_s27 = scalar_lea.vmem (!%p385_p3), [#allocation2], %s2194_s28 }
  0x3e   : > { %1734 = dma.done.wait (%p1882_p6), %s391_s26, 128  }
  0x3f   : > { %1736 = vsyncadd (%p1882_p6), %s391_s26, 4294967168  ;;  %v1762_v0 = vmov 0.0|0.0   ;;  %vm1763_vm0 = vmmov 0   ;;  %v1764_v1 = vmov 0.0   ;;  %v441_v2 = vld [vmem:[%s2178_s1] sm:$0xff]  ;;  %v442_v3 = vld [vmem:[%s2178_s1 + $0x8] sm:$0xff] }
  0x40   : > { %1528 = vmatprep.subr.bf16.mxu0 %v1762_v0  ;;  %1461 = vmatprep.mubr.msk.f32.mxu0 %vm1763_vm0, %v1764_v1  ;;  %v443_v4 = vld [vmem:[%s2178_s1 + $0x10] sm:$0xff]  ;;  %v1529_v5 = vpack.c.bf16 %v442_v3, %v441_v2  ;;  %v444_v6 = vld [vmem:[%s2178_s1 + $0x18] sm:$0xff]  ;;  %v1973_v8 = vld [vmem:[%s394_s27] sm:$0xff]  ;;  %vm445_vm1 = vcmask 261120   ;;  %s1765_s26 = smov 112   ;;  %s1766_s30 = smov 96  }
  0x41   : > { %1469 = vmatprep.subr.mxu1 %v1764_v1  ;;  %1471 = vmatprep.mubr.msk.f32.mxu1 %vm1763_vm0, %v1764_v1  ;;  %v1532_v7 = vpack.c.bf16 %v444_v6, %v443_v4  ;;  %s1767_s29 = smov 80   ;;  %vm522_vm2 = vcmask 130048   ;;  %vm597_vm3 = vcmask 64512   ;;  %s1768_s27 = smov 48   ;;  %v689_v32 = vld [vmem:[%s2179_s2] sm:$0xff]  ;;  %v690_v33 = vld [vmem:[%s2179_s2 + $0x8] sm:$0xff] }
  0x42   : > { %1530 = vmatpush3.bf16.msra.mxu0 %v1529_v5  ;;  %s1769_s20 = smov 64   ;;  %v1538_v34 = vpack.c.bf16 %v690_v33, %v689_v32  ;;  %v1400_v35 = vld [vmem:[%s2179_s2 + $0x10] sm:$0xff]  ;;  %v1401_v36 = vld [vmem:[%s2179_s2 + $0x18] sm:$0xff]  ;;  %v1041_v62 = vld [vmem:[%s2182_s5] sm:$0xff]  ;;  %vm1141_vm4 = vcmask 523264   ;;  %s1419_s13 = sshll.u32 %s1860_s25, 8 }
  0x43   : > { %1531 = vmatprep.subr.bf16.mxu0 %v1762_v0  ;;  %v1535_v37 = vpack.c.bf16 %v1401_v36, %v1400_v35  ;;  %v1042_v63 = vld [vmem:[%s2182_s5 + $0x8] sm:$0xff]  ;;  %v1043_v2 = vld [vmem:[%s2182_s5 + $0x10] sm:$0xff]  ;;  %v1044_v3 = vld [vmem:[%s2182_s5 + $0x18] sm:$0xff]  ;;  %p2207_p11 = scmp.ne.s32.totalorder %s2201_s15, 0  ;;  %s1770_s14 = smov [#allocation6]  }
  0x44   : > { %v1544_v4 = vpack.c.bf16 %v1044_v3, %v1043_v2  ;;  %v1126_v5 = vld [vmem:[%s2184_s7] sm:$0xff]  ;;  %v1127_v6 = vld [vmem:[%s2184_s7 + $0x8] sm:$0xff]  ;;  %s1665_s28 = sshll.u32 %s1770_s14, 4  ;;  %s1666_s28 = int_to_ptr.vmem [resolvable:$false] %s1665_s28 }
  0x46   : > { %1533 = vmatpush3.bf16.msra.mxu0 %v1532_v7  ;;  %v1128_v7 = vld [vmem:[%s2184_s7 + $0x10] sm:$0xff] }
  0x47   : > { %1464 = vmatprep.subr.mxu0 %v1764_v1 }
  0x49   : > { %1462 = vmatmul.mubr.msk.f32.vlgmr.msra.gmra.mrb[0].mxu0 %vm445_vm1, %v1973_v8 }
  0x4a   : > { %1466 = vmatprep.mubr.msk.f32.mxu0 %vm1763_vm0, %v1764_v1 }
 0x11c   : > { %v515_v9 = vpop.f32.mrb[0].mxu0 }
 0x11d   : > { %691 = vrot.lane.b32.xlu1 %v515_v9, %s1765_s26  ;;  %520 = vrot.lane.b32.xlu0 %v515_v9, %s1766_s30  ;;  %v1463_v10 = vpop.f32.mrb[1].mxu0  ;;  %s2092_s30 = scalar_lea.hbm %s2189_s12, %s1419_s13 }
 0x121   : > { %693 = vrot.lane.b32.xlu0 %v515_v9, %s1767_s29  ;;  %s1252_s29 = scalar_lea.sflag [#allocation7], %s1944_s18 }
 0x18f   : > { %v521_v11 = vpop.permute.xlu0 %520  ;;  %v692_v13 = vpop.permute.xlu1 %691 }
 0x190   : > { %1465 = vmatpush3.xpose.msk.msra.mxu0 %vm522_vm2, %v521_v11  ;;  %v1130_v11 = vld [vmem:[%s2184_s7 + $0x20] sm:$0xff] }
 0x191   : > { %1474 = vmatprep.subr.mxu0 %v1764_v1 }
 0x193   : > { %1467 = vmatmul.mubr.msk.f32.vlgmr.msra.gmra.mrb[2].mxu0 %vm522_vm2, %v515_v9  ;;  %v694_v12 = vpop.permute.xlu0 %693 }
 0x194   : > { %1475 = vmatpush3.xpose.msk.msra.mxu0 %vm522_vm2, %v694_v12  ;;  %1476 = vmatprep.mubr.msk.f32.mxu0 %vm1763_vm0, %v1764_v1  ;;  %v1131_v12 = vld [vmem:[%s2184_s7 + $0x28] sm:$0xff] }
 0x195   : > { %1534 = vmatprep.subr.bf16.mxu0 %v1762_v0 }
 0x197   : > { %1477 = vmatmul.mubr.msk.f32.vlgmr.msra.gmra.mrb[4].mxu0 %vm522_vm2, %v692_v13  ;;  %v1553_v13 = vpack.c.bf16 %v1131_v12, %v1130_v11 }
 0x198   : > { %1488 = vmatprep.mubr.msk.f32.mxu0 %vm1763_vm0, %v1764_v1  ;;  %1536 = vmatpush3.bf16.msra.mxu0 %v1535_v37 }
 0x199   : > { %1540 = vmatprep.subr.bf16.mxu0 %v1762_v0 }
 0x266   : > { %v593_v14 = vpop.f32.mrb[2].mxu0 }
 0x267   : > { %v1468_v15 = vpop.f32.mrb[3].mxu0  ;;  %v598_v16 = vsel %vm597_vm3, %v593_v14, -inf }
 0x268   : > { %599 = vmax.xlane.f32.xlu1 %v598_v16 }
 0x26a   : > { %v765_v17 = vpop.f32.mrb[4].mxu0 }
 0x26b   : > { %v1478_v18 = vpop.f32.mrb[5].mxu0  ;;  %v769_v19 = vsel %vm597_vm3, %v765_v17, -inf }
 0x26c   : > { %770 = vmax.xlane.f32.xlu0 %v769_v19  ;;  %v1404_v18 = vld [vmem:[%s2180_s3] ss:$0 sm:$0xff] }
 0x279   : > { %783 = vrot.lane.b32.xlu1 %v515_v9, %s1768_s27  ;;  %s1391_s27 = sshll.u32 %s1944_s18, 4 }
 0x282   : > { %611 = vrot.lane.b32.xlu0 %v515_v9, %s1769_s20  ;;  %s2017_s20 = scalar_lea.vmem [#allocation6], %s1391_s27  ;;  %v1129_v9 = vld [vmem:[%s2184_s7 + $0x18] sm:$0xff] }
 0x283   : > { %v1550_v10 = vpack.c.bf16 %v1129_v9, %v1128_v7  ;;  %s1278_s19 = sshll.u32 %s2017_s20, 4  ;;  %s2094_s19 = int_to_ptr.vmem [resolvable:$true] %s1278_s19 }
 0x284   : > { %s1661_s27 = scalar_lea.vmem %s2094_s19, 256  ;;  %p1668_p7 = scmp.lt.s32.totalorder %s2094_s19, %s1666_s28 }
 0x285   : > { %p1662_p6 = scmp.ne.s32.totalorder %s2094_s19, %s1661_s27 }
 0x287   : > { %p1663_p12 = pnand %p1662_p6, %p2207_p11 }
 0x289   : > { %p1664_p13 = pneg %p1663_p12 }
 0x2f5   : > { %v600_v20 = vpop.xlane.xlu1 %599 }
 0x2f6   : > { %v601_v21 = vsub.f32 %v593_v14, %v600_v20  ;;  %v1405_v20 = vld [vmem:[%s2181_s4] ss:$0 sm:$0xff] }
 0x2f8   : > { %v602_v22 = vmul.f32 1.442695, %v601_v21 }
 0x2f9   : > { %v771_v23 = vpop.xlane.xlu0 %770  ;;  %v784_v28 = vpop.permute.xlu1 %783 }
 0x2fa   : > { %1619 = vpow2.f32 %v602_v22  ;;  %v772_v24 = vsub.f32 %v765_v17, %v771_v23  ;;  %v1133_v23 = vld [vmem:[%s2184_s7 + $0x38] sm:$0xff] }
 0x2fc   : > { %v773_v25 = vmul.f32 1.442695, %v772_v24 }
 0x2fd   : > { %v612_v26 = vpop.permute.xlu0 %611 }
 0x2fe   : > { %1621 = vpow2.f32 %v773_v25  ;;  %1470 = vmatpush3.msra.mxu1 %v612_v26  ;;  %v1406_v25 = vld [vmem:[%s2183_s6] ss:$0 sm:$0xff] }
 0x2ff   : > { %1479 = vmatprep.subr.mxu1 %v1764_v1 }
 0x304   : > { %v1620_v27 = vpop.eup %1619 }
 0x305   : > { %1472 = vmatmul.mubr.msk.f32.vlgmr.msra.gmra.mrb[0].mxu1 %vm597_vm3, %v1620_v27  ;;  %v604_v29 = vsel %vm597_vm3, %v1620_v27, 0.0 }
 0x306   : > { %1480 = vmatpush3.msra.mxu1 %v784_v28  ;;  %605 = vadd.xlane.f32.xlu1 %v604_v29 }
 0x307   : > { %1481 = vmatprep.mubr.msk.f32.mxu1 %vm1763_vm0, %v1764_v1  ;;  %1537 = vmatprep.subr.bf16.mxu1 %v1762_v0 }
 0x308   : > { %v1622_v30 = vpop.eup %1621 }
 0x309   : > { %1482 = vmatmul.mubr.msk.f32.vlgmr.msra.gmra.mrb[2].mxu1 %vm597_vm3, %v1622_v30  ;;  %v775_v31 = vsel %vm597_vm3, %v1622_v30, 0.0 }
 0x30a   : > { %776 = vadd.xlane.f32.xlu0 %v775_v31  ;;  %1495 = vmatprep.mubr.msk.f32.mxu1 %vm1763_vm0, %v1764_v1 }
 0x30b   : > { %1539 = vmatpush3.bf16.msra.mxu1 %v1538_v34 }
 0x30c   : > { %1546 = vmatprep.subr.bf16.mxu1 %v1762_v0 }
 0x393   : > { %v606_v38 = vpop.xlane.xlu1 %605 }
 0x394   : > { %1623 = vrcp.f32 %v606_v38 }
 0x397   : > { %v777_v39 = vpop.xlane.xlu0 %776 }
 0x398   : > { %1625 = vrcp.f32 %v777_v39 }
 0x39e   : > { %v1624_v40 = vpop.eup %1623 }
 0x39f   : > { %v609_v41 = vmul.f32 %v1624_v40, %v1620_v27 }
 0x3a1   : > { %610 = vst.msk [vmem:[%s2017_s20] sm:$0xff] %vm597_vm3, %v609_v41 }
 0x3a2   : > { %v1626_v42 = vpop.eup %1625 }
 0x3a3   : > { %v780_v43 = vmul.f32 %v1626_v42, %v1622_v30  ;;  %v1408_v30 = vld [vmem:[%s2185_s8] ss:$0 sm:$0xff] }
 0x3a5   : > { %1398 = vst.msk [vmem:[%s2017_s20 + $0x8] sm:$0xff] %vm597_vm3, %v780_v43  ;;  %s1667_s20 = scalar_lea.vmem %s1666_s28, 512 }
 0x3a6   : > { %p1669_p10 = scmp.lt.s32.totalorder %s1667_s20, %s1661_s27 }
 0x3a8   : > { %p1670_p2 = por %p1669_p10, %p1668_p7 }
 0x3aa   : > { %p1671_p4 = pnand %p1670_p2, %p1664_p13 }
 0x3d8   : > { %v683_v44 = vpop.f32.mrb[0].mxu1 }
 0x3d9   : > { %v688_v45 = vmul.f32 %v1624_v40, %v683_v44  ;;  %v1473_v46 = vpop.f32.mrb[1].mxu1 }
 0x3db   : > { %1496 = vmatmul.mubr.msk.f32.vlgmr.msra.gmra.mrb[4].mxu1 %vm522_vm2, %v688_v45 }
 0x3dc   : > { %v855_v47 = vpop.f32.mrb[2].mxu1  ;;  %1525 = vmatprep.mubr.msk.f32.mxu1 %vm1763_vm0, %v1764_v1 }
 0x3dd   : > { %v860_v48 = vmul.f32 %v1626_v42, %v855_v47  ;;  %v1483_v49 = vpop.f32.mrb[3].mxu1 }
 0x3df   : > { %1489 = vmatmul.mubr.msk.f32.vlgmr.msra.gmra.mrb[6].mxu0 %vm522_vm2, %v860_v48 }
 0x3e0   : > { %1506 = vmatprep.mubr.msk.f32.mxu0 %vm1763_vm0, %v1764_v1  ;;  %v1541_v1 = vpack.c.bf16 %v1042_v63, %v1041_v62 }
 0x3e2   : > { %1542 = vmatpush3.bf16.msra.mxu0 %v1541_v1 }
 0x3e3   : > { %1543 = vmatprep.subr.bf16.mxu0 %v1762_v0 }
 0x3e6   : > { %1545 = vmatpush3.bf16.msra.mxu0 %v1544_v4 }
 0x4ae   : > { %v1006_v50 = vpop.f32.mrb[4].mxu1 }
 0x4af   : > { %v1497_v51 = vpop.f32.mrb[5].mxu1 }
 0x4b2   : > { %v933_v52 = vpop.f32.mrb[6].mxu0 }
 0x4b3   : > { %v1007_v53 = vadd.f32 %v1006_v50, %v933_v52  ;;  %v1490_v54 = vpop.f32.mrb[7].mxu0 }
 0x4b5   : > { %v1010_v55 = vadd.f32 %v1007_v53, %v1973_v8  ;;  %v1547_v8 = vpack.c.bf16 %v1127_v6, %v1126_v5 }
 0x4b7   : > { %v1011_v56 = vsel %vm445_vm1, %v1010_v55, 0.0  ;;  %1548 = vmatpush3.bf16.msra.mxu1 %v1547_v8 }
 0x4b8   : > { %1012 = vadd.xlane.f32.xlu0 %v1011_v56  ;;  %1549 = vmatprep.subr.bf16.mxu1 %v1762_v0 }
 0x4bb   : > { %1551 = vmatpush3.bf16.msra.mxu1 %v1550_v10 }
 0x4bc   : > { %1552 = vmatprep.subr.bf16.mxu1 %v1762_v0 }
 0x4bf   : > { %1554 = vmatpush3.bf16.msra.mxu1 %v1553_v13 }
 0x4c0   : > { %1555 = vmatprep.subr.bf16.mxu1 %v1762_v0  ;;  %v1132_v0 = vld [vmem:[%s2184_s7 + $0x30] sm:$0xff] }
 0x4c1   : > { %v1556_v24 = vpack.c.bf16 %v1133_v23, %v1132_v0 }
 0x4c3   : > { %1557 = vmatpush3.bf16.msra.mxu1 %v1556_v24 }
 0x545   : > { %v1013_v57 = vpop.xlane.xlu0 %1012 }
 0x546   : > { %v1015_v58 = vmul.f32 0.03125, %v1013_v57 }
 0x548   : > { %v1016_v59 = vsub.f32 %v1010_v55, %v1015_v58 }
 0x54a   : > { %v1017_v60 = vmul.f32 %v1016_v59, %v1016_v59 }
 0x54c   : > { %v1018_v61 = vsel %vm445_vm1, %v1017_v60, 0.0 }
 0x54d   : > { %1019 = vadd.xlane.f32.xlu1 %v1018_v61 }
 0x5da   : > { %v1020_v14 = vpop.xlane.xlu1 %1019 }
 0x5db   : > { %v1021_v15 = vmul.f32 0.03125, %v1020_v14 }
 0x5dd   : > { %v1022_v16 = vadd.f32 1e-06, %v1021_v15 }
 0x5df   : > { %1627 = vrsqrt.f32 %v1022_v16 }
 0x5e9   : > { %v1628_v17 = vpop.eup %1627 }
 0x5ea   : > { %v1024_v19 = vmul.f32 %v1628_v17, %v1016_v59 }
 0x5ec   : > { %v1032_v21 = vmul.f32 %v1404_v18, %v1024_v19 }
 0x5ee   : > { %v1040_v22 = vadd.f32 %v1405_v20, %v1032_v21 }
 0x5f0   : > { %1507 = vmatmul.mubr.msk.f32.vlgmr.msra.gmra.mrb[8].mxu0 %vm445_vm1, %v1040_v22 }
 0x6c3   : > { %v1121_v26 = vpop.f32.mrb[8].mxu0 }
 0x6c4   : > { %v1122_v27 = vadd.f32 %v1406_v25, %v1121_v26  ;;  %v1508_v28 = vpop.f32.mrb[9].mxu0 }
 0x6c6   : > { %v1125_v29 = vmax.f32 %v1122_v27, 0.0 }
 0x6c8   : > { %1526 = vmatmul.mubr.msk.f32.vlgmr.msra.gmra.mrb[6].mxu1 %vm1141_vm4, %v1125_v29 }
 0x79b   : > { %v1211_v31 = vpop.f32.mrb[6].mxu1 }
 0x79c   : > { %v1212_v32 = vadd.f32 %v1408_v30, %v1211_v31  ;;  %v1527_v33 = vpop.f32.mrb[7].mxu1 }
 0x79e   : > { %v1215_v34 = vadd.f32 %v1212_v32, %v1040_v22 }
 0x7a0   : > { %v1216_v35 = vsel %vm445_vm1, %v1215_v34, 0.0 }
 0x7a1   : > { %1217 = vadd.xlane.f32.xlu0 %v1216_v35 }
 0x82e   : > { %v1218_v36 = vpop.xlane.xlu0 %1217 }
 0x82f   : > { %v1219_v37 = vmul.f32 0.03125, %v1218_v36 }
 0x831   : > { %v1220_v38 = vsub.f32 %v1215_v34, %v1219_v37 }
 0x833   : > { %v1221_v39 = vmul.f32 %v1220_v38, %v1220_v38 }
 0x835   : > { %v1222_v40 = vsel %vm445_vm1, %v1221_v39, 0.0 }
 0x836   : > { %1223 = vadd.xlane.f32.xlu1 %v1222_v40 }
 0x837   : > { %1674 = shalt.err (!%p1671_p4)
}
 0x838   : > { %s1675_s17 = scalar_lea.hbm %s2092_s30, 256  ;;  %s1679_s26 = scalar_lea.hbm %s2189_s12, 512 }
 0x839   : > { %p1676_p5 = scmp.ne.s32.totalorder %s2092_s30, %s1675_s17  ;;  %p1680_p0 = scmp.lt.u32.totalorder %s2092_s30, %s2189_s12 }
 0x83a   : > { %p1681_p1 = scmp.lt.u32.totalorder %s1679_s26, %s1675_s17  ;;  %p1683_p6 = scmp.lt.u32.totalorder %s1675_s17, %s2092_s30 }
 0x83b   : > { %p1677_p8 = pnand %p1676_p5, %p2207_p11 }
 0x83c   : > { %p1682_p3 = por %p1681_p1, %p1680_p0 }
 0x83d   : > { %p1678_p9 = pneg %p1677_p8 }
 0x83e   : > { %p1684_p12 = por %p1683_p6, %p1682_p3 }
 0x840   : > { %p1685_p13 = pnand %p1684_p12, %p1678_p9 }
 0x842   : > { %1688 = shalt.err (!%p1685_p13)
}
 0x843   : > { %s1771_s27 = smov 128   ;;  %s1772_s20 = smov 8   ;;  %v1410_v45 = vld [vmem:[%s2186_s9] ss:$0 sm:$0xff] }
 0x844   : > { %1561 = dma.vmem_to_hbm [thread:$0]  (%p2207_p11), %s2094_s19, 256, %s2092_s30, %s1252_s29, %s1771_s27, %s1771_s27, %s1772_s20  }
 0x845   : > { %v1411_v47 = vld [vmem:[%s2187_s10] ss:$0 sm:$0xff]  ;;  %s1414_s14 = sshll.u32 %s1860_s25, 7  ;;  %s2208_s28 = sshll.u32 %s1944_s18, 3 }
 0x846   : > { %s432_s0 = scalar_lea.vmem [#allocation5], %s2208_s28  ;;  %s2132_s27 = scalar_lea.hbm %s2188_s11, %s1414_s14 }
 0x847   : > { %s1265_s19 = sshll.u32 %s432_s0, 4  ;;  %s1247_s20 = scalar_lea.sflag [#allocation4], %s1944_s18  ;;  %s2134_s19 = int_to_ptr.vmem [resolvable:$true] %s1265_s19 }
 0x848   : > { %s1689_s17 = scalar_lea.vmem %s2134_s19, 128  ;;  %s1773_s25 = smov [#allocation5]  }
 0x849   : > { %p1690_p7 = scmp.ne.s32.totalorder %s2134_s19, %s1689_s17  ;;  %s1693_s13 = sshll.u32 %s1773_s25, 4  ;;  %s1694_s13 = int_to_ptr.vmem [resolvable:$false] %s1693_s13 }
 0x84a   : > { %s1695_s23 = scalar_lea.vmem %s1694_s13, 256  ;;  %p1696_p4 = scmp.lt.s32.totalorder %s2134_s19, %s1694_s13 }
 0x84b   : > { %p1691_p10 = pnand %p1690_p7, %p2207_p11  ;;  %p1697_p5 = scmp.lt.s32.totalorder %s1695_s23, %s1689_s17 }
 0x84d   : > { %p1692_p2 = pneg %p1691_p10  ;;  %p1698_p8 = por %p1697_p5, %p1696_p4 }
 0x84f   : > { %p1699_p9 = pnand %p1698_p8, %p1692_p2 }
 0x8c3   : > { %v1224_v41 = vpop.xlane.xlu1 %1223 }
 0x8c4   : > { %v1225_v42 = vmul.f32 0.03125, %v1224_v41 }
 0x8c6   : > { %v1226_v43 = vadd.f32 1e-06, %v1225_v42 }
 0x8c8   : > { %1629 = vrsqrt.f32 %v1226_v43 }
 0x8d2   : > { %v1630_v44 = vpop.eup %1629 }
 0x8d3   : > { %v1228_v46 = vmul.f32 %v1630_v44, %v1220_v38 }
 0x8d5   : > { %v1236_v48 = vmul.f32 %v1410_v45, %v1228_v46 }
 0x8d7   : > { %v1244_v49 = vadd.f32 %v1411_v47, %v1236_v48 }
 0x8d9   : > { %1245 = vst.msk [vmem:[%s432_s0] sm:$0xff] %vm445_vm1, %v1244_v49 }
 0x8da   : > { %1702 = shalt.err (!%p1699_p9)
}
 0x8db   : > { %s1703_s0 = scalar_lea.hbm %s2132_s27, 128  ;;  %s1707_s14 = scalar_lea.hbm %s2188_s11, 256 }
 0x8dc   : > { %p1704_p0 = scmp.ne.s32.totalorder %s2132_s27, %s1703_s0  ;;  %p1708_p6 = scmp.lt.u32.totalorder %s2132_s27, %s2188_s11 }
 0x8dd   : > { %p1709_p12 = scmp.lt.u32.totalorder %s1707_s14, %s1703_s0  ;;  %p1711_p7 = scmp.lt.u32.totalorder %s1703_s0, %s2132_s27 }
 0x8de   : > { %p1705_p1 = pnand %p1704_p0, %p2207_p11 }
 0x8df   : > { %p1710_p13 = por %p1709_p12, %p1708_p6 }
 0x8e0   : > { %p1706_p3 = pneg %p1705_p1 }
 0x8e1   : > { %p1712_p10 = por %p1711_p7, %p1710_p13 }
 0x8e3   : > { %p1713_p2 = pnand %p1712_p10, %p1706_p3 }
 0x8e5   : > { %1716 = shalt.err (!%p1713_p2)
}
 0x8e6   : > { %1560 = dma.vmem_to_hbm [thread:$0]  (%p2207_p11), %s2134_s19, 128, %s2132_s27, %s1247_s20  }
 0x8e7 PF: > { %s1293_s29 = sand.u32 1, %s1747_s21   ;;  %p2209_p4 = scmp.ne.s32.totalorder %s2202_s16, 0 }
 0x8e8   : > { %p2210_p5 = scmp.ge.s32.totalorder %s1759_s24, 2  ;;  %s1294_s17 = scalar_lea.sflag [#allocation4], %s1293_s29 }
 0x8ea   : > { %p1569_p8 = pnand %p2210_p5, %p2209_p4 }
 0x8ec   : > { %1738 = dma.done.wait (!%p1569_p8), %s1294_s17, 128  }
 0x8ed   : > { %1740 = vsyncadd (!%p1569_p8), %s1294_s17, 4294967168  ;;  %s1303_s25 = scalar_lea.sflag [#allocation7], %s1293_s29 }
 0x8ee   : > { %1742 = dma.done.wait (!%p1569_p8), %s1303_s25, 256  }
 0x8ef   : > { %1744 = vsyncadd (!%p1569_p8), %s1303_s25, 4294967040  ;;  %s2211_s24 = sld [smem:[#allocation12_spill]]  ;;  %s2212_s15 = sld [smem:[#allocation11_spill]] }
 0x8f0   : > { %s2213_s23 = sld [smem:[#allocation13_spill]]  ;;  %s2214_s21 = smov %s1751_s22 }
 0x8f5   : > { %p29_p11 = scmp.ge.s32.totalorder %s2211_s24, 4   ;;  %s2215_s22 = smov %s2212_s15 }
 0x8f7   :  { %31 = sbr.rel (!%p29_p11) target bundleno = 9 (0x9), region = 128 }
 0x8fe   :  { %1308 = vsyncpa [#allocation3], 1 }
 0x8ff   :  { %1310 = vsyncpa [#allocation3 + $0x1], 1 }
 0x900   :  { %1311 = vsyncpa [#allocation4], 1 }
 0x901   :  { %1313 = vsyncpa [#allocation4 + $0x1], 1 }
 0x902   :  { %1314 = vsyncpa [#allocation7], 1 }
 0x903   :  { %1316 = vsyncpa [#allocation7 + $0x1], 1 }

</bundles_post_ra>
